<compile_context>
chip_gen: v6e
topology: v6e:2x2x1
jax: 0.10.0
libtpu: 0.0.40
codegen_flags: <defaults>
</compile_context>

<pallas_src>
import functools

import jax
import jax.numpy as jnp
from jax.experimental import pallas as pl
from jax.experimental.pallas import tpu as pltpu

# ------------------------- model hyper-parameters ---------------------------
DIM = 4            # config.data.dim
HIDDEN = 32        # config.model.hidden_dim
NUM_HIDDEN1 = 2    # config.model.num_hidden1
NUM_HIDDEN2 = 2    # config.model.num_hidden2
BN_EPS = 1e-5      # nn.BatchNorm1d default
MATMUL_DTYPE = jnp.bfloat16   # MXU operand dtype (accumulation stays f32)

# ------------------------- packed-parameter layout ---------------------------
# Weight slab: [NW, HIDDEN + 1, HIDDEN] f32
#   slab[l, :in_dim, :out_dim] = W_l stored as [in, out] (PyTorch weight.T)
#   slab[l, HIDDEN,  :out_dim] = noise-column weights for layers that see
#                                cat([h, noise]); zero otherwise.
# Bias slab: [NB_ROWS, HIDDEN] f32 (one row per bias / BN affine vector).
LW_IN = 0
LW_1 = LW_IN + 1
LW_MID = LW_1 + NUM_HIDDEN1
LW_2 = LW_MID + 1
LW_OUT = LW_2 + NUM_HIDDEN2
NW = LW_OUT + 1                     # 7 weight matrices

ROW_B_IN, ROW_GAMMA, ROW_BETA = 0, 1, 2
ROW_B1 = 3
ROW_B_MID = ROW_B1 + NUM_HIDDEN1
ROW_B2 = ROW_B_MID + 1
ROW_B_OUT = ROW_B2 + NUM_HIDDEN2
NB_ROWS = ROW_B_OUT + 1             # 9 bias/affine rows


# ------------------------------ kernel helpers -------------------------------
def _dense(h, noise, w_ref, b_ref, layer, bias_row, k, n_out, with_noise):
    """bf16 matmul (f32 acc) on the x-part + f32 bias (+ f32 noise column)."""
    wx = w_ref[layer, :k, :n_out].astype(MATMUL_DTYPE)
    out = jnp.dot(h.astype(MATMUL_DTYPE), wx, preferred_element_type=jnp.float32)
    out = out + b_ref[bias_row:bias_row + 1, :n_out]
    if with_noise:
        out = out + noise * w_ref[layer, HIDDEN:HIDDEN + 1, :n_out]
    return out


def _lin_in_relu(x, noise, w_ref, b_ref):
    h = _dense(x, noise, w_ref, b_ref, LW_IN, ROW_B_IN, DIM, HIDDEN, True)
    return jnp.maximum(h, 0.0)


# --------------------------------- kernels -----------------------------------
def _bn_stats_kernel(x_ref, n_ref, w_ref, b_ref, stats_ref):
    """Pass 1: accumulate full-batch per-feature sum / sum-of-squares of
    h1 = relu(lin_in(cat(x, noise)))."""
    h = _lin_in_relu(x_ref[...], n_ref[...], w_ref, b_ref)          # [TB, H] f32
    tile = jnp.concatenate(
        [jnp.sum(h, axis=0, keepdims=True),
         jnp.sum(h * h, axis=0, keepdims=True)], axis=0)            # [2, H]

    @pl.when(pl.program_id(0) == 0)
    def _():
        stats_ref[...] = tile

    @pl.when(pl.program_id(0) != 0)
    def _():
        stats_ref[...] = stats_ref[...] + tile


def _forward_kernel(inv_batch, x_ref, n_ref, stats_ref, w_ref, b_ref, o_ref):
    """Pass 2: recompute h1, apply exact full-batch BatchNorm, then run the
    rest of the network on this batch tile."""
    noise = n_ref[...]                                              # [TB, 1]
    act = lambda v: jnp.maximum(v, 0.0)                             # ReLU

    # ---- lin_in over cat([x, noise], 1), ReLU ----
    h = _lin_in_relu(x_ref[...], noise, w_ref, b_ref)               # [TB, H]

    # ---- BatchNorm1d (training mode, full-batch biased stats) ----
    mean = stats_ref[0:1, :] * inv_batch                            # [1, H]
    var = jnp.maximum(stats_ref[1:2, :] * inv_batch - mean * mean, 0.0)
    h = (h - mean) * jax.lax.rsqrt(var + BN_EPS)
    h = h * b_ref[ROW_GAMMA:ROW_GAMMA + 1, :] + b_ref[ROW_BETA:ROW_BETA + 1, :]

    # ---- inner_layers1 ----
    for l in range(NUM_HIDDEN1):
        h = act(_dense(h, noise, w_ref, b_ref, LW_1 + l, ROW_B1 + l,
                       HIDDEN, HIDDEN, False))

    # ---- middle_layer over cat([h, noise], 1), then act(m) * m ----
    m = _dense(h, noise, w_ref, b_ref, LW_MID, ROW_B_MID, HIDDEN, HIDDEN, True)
    h = act(m) * m

    # ---- inner_layers2 ----
    for l in range(NUM_HIDDEN2):
        h = act(_dense(h, noise, w_ref, b_ref, LW_2 + l, ROW_B2 + l,
                       HIDDEN, HIDDEN, False))

    # ---- lin_out over cat([h, noise], 1) ----
    out = _dense(h, noise, w_ref, b_ref, LW_OUT, ROW_B_OUT, HIDDEN, DIM, True)
    o_ref[...] = out.astype(o_ref.dtype)


# -------------------------------- wrapper ------------------------------------
@functools.partial(jax.jit, static_argnames=("block_rows",))
def toy_conditional_model(x, noise_labels, w_slab, b_slab, block_rows=128):
    """x: [B, DIM] f32, noise_labels: [B] f32 -> [B, DIM] f32."""
    B = x.shape[0]
    noise = noise_labels.reshape(B, 1).astype(jnp.float32)

    tb = block_rows if (B % block_rows == 0) else B   # batch row tile
    nt = B // tb

    x_spec = pl.BlockSpec((tb, DIM), lambda i: (i, 0))
    n_spec = pl.BlockSpec((tb, 1), lambda i: (i, 0))
    # Parameter slabs / stats: constant block index -> fetched once, resident.
    w_spec = pl.BlockSpec((NW, HIDDEN + 1, HIDDEN), lambda i: (0, 0, 0))
    b_spec = pl.BlockSpec((NB_ROWS, HIDDEN), lambda i: (0, 0))
    stats_spec = pl.BlockSpec((2, HIDDEN), lambda i: (0, 0))

    # Pass 1: full-batch BatchNorm statistics (reduction over the batch grid).
    stats = pl.pallas_call(
        _bn_stats_kernel,
        out_shape=jax.ShapeDtypeStruct((2, HIDDEN), jnp.float32),
        grid=(nt,),
        in_specs=[x_spec, n_spec, w_spec, b_spec],
        out_specs=stats_spec,
        compiler_params=pltpu.CompilerParams(
            dimension_semantics=("arbitrary",)),
    )(x, noise, w_slab, b_slab)

    # Pass 2: the forward pass, batch-parallel (megacore split on v7x).
    return pl.pallas_call(
        functools.partial(_forward_kernel, 1.0 / B),
        out_shape=jax.ShapeDtypeStruct((B, DIM), jnp.float32),
        grid=(nt,),
        in_specs=[x_spec, n_spec, stats_spec, w_spec, b_spec],
        out_specs=pl.BlockSpec((tb, DIM), lambda i: (i, 0)),
        compiler_params=pltpu.CompilerParams(
            dimension_semantics=("parallel",)),
    )(x, noise, stats, w_slab, b_slab)


# --------------------------- parameter creation -------------------------------
def make_params(key):
    def lin(k, fan_in, fan_out):
        kw, kb = jax.random.split(k)
        w = jax.random.normal(kw, (fan_in, fan_out), jnp.float32) * 0.1
        b = jax.random.normal(kb, (1, fan_out), jnp.float32) * 0.1
        return w, b

    k_in, k1, k_mid, k2, k_out = jax.random.split(key, 5)
    w_in, b_in = lin(k_in, DIM + 1, HIDDEN)
    w1b1 = [lin(k, HIDDEN, HIDDEN) for k in jax.random.split(k1, NUM_HIDDEN1)]
    w_mid, b_mid = lin(k_mid, HIDDEN + 1, HIDDEN)
    w2b2 = [lin(k, HIDDEN, HIDDEN) for k in jax.random.split(k2, NUM_HIDDEN2)]
    w_out, b_out = lin(k_out, HIDDEN + 1, DIM)

    return {
        "win_x": w_in[:DIM], "win_n": w_in[DIM:DIM + 1], "b_in": b_in,
        "bn_gamma": jnp.ones((1, HIDDEN), jnp.float32),
        "bn_beta": jnp.zeros((1, HIDDEN), jnp.float32),
        "w1": jnp.stack([w for w, _ in w1b1]),
        "b1": jnp.stack([b for _, b in w1b1]),
        "wmid_x": w_mid[:HIDDEN], "wmid_n": w_mid[HIDDEN:HIDDEN + 1],
        "b_mid": b_mid,
        "w2": jnp.stack([w for w, _ in w2b2]),
        "b2": jnp.stack([b for _, b in w2b2]),
        "wout_x": w_out[:HIDDEN], "wout_n": w_out[HIDDEN:HIDDEN + 1],
        "b_out": b_out,
    }


def pack_params(p):
    """Pack the logical parameters into the two kernel slabs (done once)."""
    w = jnp.zeros((NW, HIDDEN + 1, HIDDEN), jnp.float32)
    w = w.at[LW_IN, :DIM, :].set(p["win_x"])
    w = w.at[LW_IN, HIDDEN, :].set(p["win_n"][0])
    for l in range(NUM_HIDDEN1):
        w = w.at[LW_1 + l, :HIDDEN, :].set(p["w1"][l])
    w = w.at[LW_MID, :HIDDEN, :].set(p["wmid_x"])
    w = w.at[LW_MID, HIDDEN, :].set(p["wmid_n"][0])
    for l in range(NUM_HIDDEN2):
        w = w.at[LW_2 + l, :HIDDEN, :].set(p["w2"][l])
    w = w.at[LW_OUT, :HIDDEN, :DIM].set(p["wout_x"])
    w = w.at[LW_OUT, HIDDEN, :DIM].set(p["wout_n"][0])

    b = jnp.zeros((NB_ROWS, HIDDEN), jnp.float32)
    b = b.at[ROW_B_IN].set(p["b_in"][0])
    b = b.at[ROW_GAMMA].set(p["bn_gamma"][0])
    b = b.at[ROW_BETA].set(p["bn_beta"][0])
    for l in range(NUM_HIDDEN1):
        b = b.at[ROW_B1 + l].set(p["b1"][l, 0])
    b = b.at[ROW_B_MID].set(p["b_mid"][0])
    for l in range(NUM_HIDDEN2):
        b = b.at[ROW_B2 + l].set(p["b2"][l, 0])
    b = b.at[ROW_B_OUT, :DIM].set(p["b_out"][0])
    return w, b


# ------------------- plain-JAX reference (mirrors kernel math) ----------------
def reference(x, noise_labels, p):
    """Same forward as the PyTorch module, mirroring the kernel's bf16 matmul
    operands (f32 accumulation) and E[h^2]-mean^2 variance."""
    n = noise_labels[:, None].astype(jnp.float32)

    def mm(a, w):
        return jnp.dot(a.astype(MATMUL_DTYPE), w.astype(MATMUL_DTYPE),
                       preferred_element_type=jnp.float32)

    act = lambda v: jnp.maximum(v, 0.0)
    h = act(mm(x, p["win_x"]) + n * p["win_n"] + p["b_in"])
    mean = jnp.mean(h, axis=0, keepdims=True)
    var = jnp.maximum(jnp.mean(h * h, axis=0, keepdims=True) - mean * mean, 0.0)
    h = (h - mean) * jax.lax.rsqrt(var + BN_EPS)
    h = h * p["bn_gamma"] + p["bn_beta"]
    for l in range(NUM_HIDDEN1):
        h = act(mm(h, p["w1"][l]) + p["b1"][l])
    m = mm(h, p["wmid_x"]) + n * p["wmid_n"] + p["b_mid"]
    h = act(m) * m
    for l in range(NUM_HIDDEN2):
        h = act(mm(h, p["w2"][l]) + p["b2"][l])
    return mm(h, p["wout_x"]) + n * p["wout_n"] + p["b_out"]


if __name__ == "__main__":
    key = jax.random.PRNGKey(0)
    kx, kn, kp = jax.random.split(key, 3)

    BATCH = 256                       # two 128-row tiles -> exercises the grid
    x = jax.random.normal(kx, (BATCH, DIM), jnp.float32)
    noise_labels = jax.random.uniform(kn, (BATCH,), jnp.float32)

    params = make_params(kp)
    w_slab, b_slab = pack_params(params)   # packed once, reused across calls

    out = toy_conditional_model(x, noise_labels, w_slab, b_slab)
    out = jax.block_until_ready(out)
    assert out.shape == (BATCH, DIM)

    ref = reference(x, noise_labels, params)
    assert jnp.allclose(out, ref, atol=5e-3, rtol=5e-3), (
        "kernel output mismatch vs JAX reference")

    print("KERNEL_OK")
</pallas_src>

<mosaic_0001>
module attributes {stable_mosaic.version = 11 : i64} {
  func.func @_bn_stats_kernel(%arg0: i32, %arg1: memref<128x4xf32, #tpu.memory_space<vmem>>, %arg2: memref<128x1xf32, #tpu.memory_space<vmem>>, %arg3: memref<7x33x32xf32, #tpu.memory_space<vmem>>, %arg4: memref<9x32xf32, #tpu.memory_space<vmem>>, %arg5: memref<2x32xf32, #tpu.memory_space<vmem>>) attributes {dimension_semantics = [#tpu.dimension_semantics<arbitrary>], iteration_bounds = array<i64: 2>, scalar_prefetch = 0 : i64, scratch_operands = 0 : i64, tpu.core_type = #tpu.core_type<tc>, window_params = [{transform_indices = @transform_0, window_bounds = array<i64: 128, 4>}, {transform_indices = @transform_1, window_bounds = array<i64: 128, 1>}, {pipeline_mode = #tpu.pipeline_mode<synchronous>, transform_indices = @transform_2, window_bounds = array<i64: 7, 33, 32>}, {pipeline_mode = #tpu.pipeline_mode<synchronous>, transform_indices = @transform_3, window_bounds = array<i64: 9, 32>}, {pipeline_mode = #tpu.pipeline_mode<synchronous>, transform_indices = @transform_4, window_bounds = array<i64: 2, 32>}]} {
    %c0 = arith.constant 0 : index
    %c0_0 = arith.constant 0 : index
    %0 = vector.load %arg1[%c0, %c0_0] : memref<128x4xf32, #tpu.memory_space<vmem>>, vector<128x4xf32>
    %c0_1 = arith.constant 0 : index
    %c0_2 = arith.constant 0 : index
    %1 = vector.load %arg2[%c0_1, %c0_2] : memref<128x1xf32, #tpu.memory_space<vmem>>, vector<128x1xf32>
    %c0_3 = arith.constant 0 : index
    %c0_4 = arith.constant 0 : index
    %c0_5 = arith.constant 0 : index
    %2 = vector.load %arg3[%c0_3, %c0_4, %c0_5] : memref<7x33x32xf32, #tpu.memory_space<vmem>>, vector<1x4x32xf32>
    %3 = vector.shape_cast %2 : vector<1x4x32xf32> to vector<4x32xf32>
    %4 = arith.truncf %3 : vector<4x32xf32> to vector<4x32xbf16>
    %5 = arith.truncf %0 : vector<128x4xf32> to vector<128x4xbf16>
    %cst = arith.constant dense<0.000000e+00> : vector<128x32xf32>
    %6 = tpu.matmul %5, %4, %cst {dimension_numbers = #tpu.dot_dimension_numbers<[1], [0], [0], [1], [0, 0, 1, 1], [], []>} : vector<128x4xbf16>, vector<4x32xbf16>, vector<128x32xf32> -> vector<128x32xf32>
    %c0_6 = arith.constant 0 : index
    %c0_7 = arith.constant 0 : index
    %7 = vector.load %arg4[%c0_6, %c0_7] : memref<9x32xf32, #tpu.memory_space<vmem>>, vector<1x32xf32>
    %8 = vector.broadcast %7 : vector<1x32xf32> to vector<128x32xf32>
    %9 = arith.addf %6, %8 : vector<128x32xf32>
    %c0_8 = arith.constant 0 : index
    %c32 = arith.constant 32 : index
    %c0_9 = arith.constant 0 : index
    %10 = vector.load %arg3[%c0_8, %c32, %c0_9] : memref<7x33x32xf32, #tpu.memory_space<vmem>>, vector<1x1x32xf32>
    %11 = vector.shape_cast %10 : vector<1x1x32xf32> to vector<1x32xf32>
    %12 = vector.broadcast %1 : vector<128x1xf32> to vector<128x32xf32>
    %13 = vector.broadcast %11 : vector<1x32xf32> to vector<128x32xf32>
    %14 = arith.mulf %12, %13 : vector<128x32xf32>
    %15 = arith.addf %9, %14 : vector<128x32xf32>
    %cst_10 = arith.constant 0.000000e+00 : f32
    %16 = vector.broadcast %cst_10 : f32 to vector<128x32xf32>
    %17 = arith.maximumf %15, %16 : vector<128x32xf32>
    %cst_11 = arith.constant dense<0.000000e+00> : vector<32xf32>
    %18 = vector.multi_reduction <add>, %17, %cst_11 [0] : vector<128x32xf32> to vector<32xf32>
    %19 = vector.shape_cast %18 : vector<32xf32> to vector<1x32xf32>
    %20 = arith.mulf %17, %17 : vector<128x32xf32>
    %cst_12 = arith.constant dense<0.000000e+00> : vector<32xf32>
    %21 = vector.multi_reduction <add>, %20, %cst_12 [0] : vector<128x32xf32> to vector<32xf32>
    %22 = vector.shape_cast %21 : vector<32xf32> to vector<1x32xf32>
    %23 = tpu.concatenate %19, %22 in 0 : vector<1x32xf32>, vector<1x32xf32> -> vector<2x32xf32>
    %c0_i32 = arith.constant 0 : i32
    %24 = arith.cmpi eq, %arg0, %c0_i32 : i32
    %25 = arith.extui %24 : i1 to i32
    %c0_i32_13 = arith.constant 0 : i32
    %26 = arith.cmpi ne, %25, %c0_i32_13 : i32
    scf.if %26 {
      %c0_16 = arith.constant 0 : index
      %c0_17 = arith.constant 0 : index
      %30 = vector.load %arg5[%c0_16, %c0_17] : memref<2x32xf32, #tpu.memory_space<vmem>>, vector<2x32xf32>
      tpu.vector_store %arg5[%c0_16, %c0_17], %23 {strides = array<i32>} : memref<2x32xf32, #tpu.memory_space<vmem>>, vector<2x32xf32>,
    } else {
    }
    %c0_i32_14 = arith.constant 0 : i32
    %27 = arith.cmpi ne, %arg0, %c0_i32_14 : i32
    %28 = arith.extui %27 : i1 to i32
    %c0_i32_15 = arith.constant 0 : i32
    %29 = arith.cmpi ne, %28, %c0_i32_15 : i32
    scf.if %29 {
      %c0_16 = arith.constant 0 : index
      %c0_17 = arith.constant 0 : index
      %30 = vector.load %arg5[%c0_16, %c0_17] : memref<2x32xf32, #tpu.memory_space<vmem>>, vector<2x32xf32>
      %31 = arith.addf %30, %23 : vector<2x32xf32>
      %c0_18 = arith.constant 0 : index
      %c0_19 = arith.constant 0 : index
      %32 = vector.load %arg5[%c0_18, %c0_19] : memref<2x32xf32, #tpu.memory_space<vmem>>, vector<2x32xf32>
      tpu.vector_store %arg5[%c0_18, %c0_19], %31 {strides = array<i32>} : memref<2x32xf32, #tpu.memory_space<vmem>>, vector<2x32xf32>,
    } else {
    }
    return
  }
  func.func @transform_0(%arg0: i32) -> (i32, i32) {
    %c0_i32 = arith.constant 0 : i32
    %c0_i32_0 = arith.constant 0 : i32
    return %arg0, %c0_i32 : i32, i32
  }
  func.func @transform_1(%arg0: i32) -> (i32, i32) {
    %c0_i32 = arith.constant 0 : i32
    %c0_i32_0 = arith.constant 0 : i32
    return %arg0, %c0_i32 : i32, i32
  }
  func.func @transform_2(%arg0: i32) -> (i32, i32, i32) {
    %c0_i32 = arith.constant 0 : i32
    %c0_i32_0 = arith.constant 0 : i32
    %c0_i32_1 = arith.constant 0 : i32
    %c0_i32_2 = arith.constant 0 : i32
    return %c0_i32, %c0_i32_0, %c0_i32_1 : i32, i32, i32
  }
  func.func @transform_3(%arg0: i32) -> (i32, i32) {
    %c0_i32 = arith.constant 0 : i32
    %c0_i32_0 = arith.constant 0 : i32
    %c0_i32_1 = arith.constant 0 : i32
    return %c0_i32, %c0_i32_0 : i32, i32
  }
  func.func @transform_4(%arg0: i32) -> (i32, i32) {
    %c0_i32 = arith.constant 0 : i32
    %c0_i32_0 = arith.constant 0 : i32
    %c0_i32_1 = arith.constant 0 : i32
    return %c0_i32, %c0_i32_0 : i32, i32
  }
}

module attributes {stable_mosaic.version = 11 : i64} {
  func.func @_forward_kernel(%arg0: i32, %arg1: memref<128x4xf32, #tpu.memory_space<vmem>>, %arg2: memref<128x1xf32, #tpu.memory_space<vmem>>, %arg3: memref<2x32xf32, #tpu.memory_space<vmem>>, %arg4: memref<7x33x32xf32, #tpu.memory_space<vmem>>, %arg5: memref<9x32xf32, #tpu.memory_space<vmem>>, %arg6: memref<128x4xf32, #tpu.memory_space<vmem>>) attributes {dimension_semantics = [#tpu.dimension_semantics<parallel>], iteration_bounds = array<i64: 2>, scalar_prefetch = 0 : i64, scratch_operands = 0 : i64, tpu.core_type = #tpu.core_type<tc>, window_params = [{transform_indices = @transform_0, window_bounds = array<i64: 128, 4>}, {transform_indices = @transform_1, window_bounds = array<i64: 128, 1>}, {pipeline_mode = #tpu.pipeline_mode<synchronous>, transform_indices = @transform_2, window_bounds = array<i64: 2, 32>}, {pipeline_mode = #tpu.pipeline_mode<synchronous>, transform_indices = @transform_3, window_bounds = array<i64: 7, 33, 32>}, {pipeline_mode = #tpu.pipeline_mode<synchronous>, transform_indices = @transform_4, window_bounds = array<i64: 9, 32>}, {transform_indices = @transform_5, window_bounds = array<i64: 128, 4>}]} {
    %c0 = arith.constant 0 : index
    %c0_0 = arith.constant 0 : index
    %0 = vector.load %arg2[%c0, %c0_0] : memref<128x1xf32, #tpu.memory_space<vmem>>, vector<128x1xf32>
    %c0_1 = arith.constant 0 : index
    %c0_2 = arith.constant 0 : index
    %1 = vector.load %arg1[%c0_1, %c0_2] : memref<128x4xf32, #tpu.memory_space<vmem>>, vector<128x4xf32>
    %c0_3 = arith.constant 0 : index
    %c0_4 = arith.constant 0 : index
    %c0_5 = arith.constant 0 : index
    %2 = vector.load %arg4[%c0_3, %c0_4, %c0_5] : memref<7x33x32xf32, #tpu.memory_space<vmem>>, vector<1x4x32xf32>
    %3 = vector.shape_cast %2 : vector<1x4x32xf32> to vector<4x32xf32>
    %4 = arith.truncf %3 : vector<4x32xf32> to vector<4x32xbf16>
    %5 = arith.truncf %1 : vector<128x4xf32> to vector<128x4xbf16>
    %cst = arith.constant dense<0.000000e+00> : vector<128x32xf32>
    %6 = tpu.matmul %5, %4, %cst {dimension_numbers = #tpu.dot_dimension_numbers<[1], [0], [0], [1], [0, 0, 1, 1], [], []>} : vector<128x4xbf16>, vector<4x32xbf16>, vector<128x32xf32> -> vector<128x32xf32>
    %c0_6 = arith.constant 0 : index
    %c0_7 = arith.constant 0 : index
    %7 = vector.load %arg5[%c0_6, %c0_7] : memref<9x32xf32, #tpu.memory_space<vmem>>, vector<1x32xf32>
    %8 = vector.broadcast %7 : vector<1x32xf32> to vector<128x32xf32>
    %9 = arith.addf %6, %8 : vector<128x32xf32>
    %c0_8 = arith.constant 0 : index
    %c32 = arith.constant 32 : index
    %c0_9 = arith.constant 0 : index
    %10 = vector.load %arg4[%c0_8, %c32, %c0_9] : memref<7x33x32xf32, #tpu.memory_space<vmem>>, vector<1x1x32xf32>
    %11 = vector.shape_cast %10 : vector<1x1x32xf32> to vector<1x32xf32>
    %12 = vector.broadcast %0 : vector<128x1xf32> to vector<128x32xf32>
    %13 = vector.broadcast %11 : vector<1x32xf32> to vector<128x32xf32>
    %14 = arith.mulf %12, %13 : vector<128x32xf32>
    %15 = arith.addf %9, %14 : vector<128x32xf32>
    %cst_10 = arith.constant 0.000000e+00 : f32
    %16 = vector.broadcast %cst_10 : f32 to vector<128x32xf32>
    %17 = arith.maximumf %15, %16 : vector<128x32xf32>
    %c0_11 = arith.constant 0 : index
    %c0_12 = arith.constant 0 : index
    %18 = vector.load %arg3[%c0_11, %c0_12] : memref<2x32xf32, #tpu.memory_space<vmem>>, vector<1x32xf32>
    %cst_13 = arith.constant 3.906250e-03 : f32
    %19 = vector.broadcast %cst_13 : f32 to vector<1x32xf32>
    %20 = arith.mulf %18, %19 : vector<1x32xf32>
    %c1 = arith.constant 1 : index
    %c0_14 = arith.constant 0 : index
    %21 = vector.load %arg3[%c1, %c0_14] : memref<2x32xf32, #tpu.memory_space<vmem>>, vector<1x32xf32>
    %cst_15 = arith.constant 3.906250e-03 : f32
    %22 = vector.broadcast %cst_15 : f32 to vector<1x32xf32>
    %23 = arith.mulf %21, %22 : vector<1x32xf32>
    %24 = arith.mulf %20, %20 : vector<1x32xf32>
    %25 = arith.subf %23, %24 : vector<1x32xf32>
    %cst_16 = arith.constant 0.000000e+00 : f32
    %26 = vector.broadcast %cst_16 : f32 to vector<1x32xf32>
    %27 = arith.maximumf %25, %26 : vector<1x32xf32>
    %28 = vector.broadcast %20 : vector<1x32xf32> to vector<128x32xf32>
    %29 = arith.subf %17, %28 : vector<128x32xf32>
    %cst_17 = arith.constant 9.99999974E-6 : f32
    %30 = vector.broadcast %cst_17 : f32 to vector<1x32xf32>
    %31 = arith.addf %27, %30 : vector<1x32xf32>
    %32 = math.rsqrt %31 : vector<1x32xf32>
    %33 = vector.broadcast %32 : vector<1x32xf32> to vector<128x32xf32>
    %34 = arith.mulf %29, %33 : vector<128x32xf32>
    %c1_18 = arith.constant 1 : index
    %c0_19 = arith.constant 0 : index
    %35 = vector.load %arg5[%c1_18, %c0_19] : memref<9x32xf32, #tpu.memory_space<vmem>>, vector<1x32xf32>
    %36 = vector.broadcast %35 : vector<1x32xf32> to vector<128x32xf32>
    %37 = arith.mulf %34, %36 : vector<128x32xf32>
    %c2 = arith.constant 2 : index
    %c0_20 = arith.constant 0 : index
    %38 = vector.load %arg5[%c2, %c0_20] : memref<9x32xf32, #tpu.memory_space<vmem>>, vector<1x32xf32>
    %39 = vector.broadcast %38 : vector<1x32xf32> to vector<128x32xf32>
    %40 = arith.addf %37, %39 : vector<128x32xf32>
    %c1_21 = arith.constant 1 : index
    %c0_22 = arith.constant 0 : index
    %c0_23 = arith.constant 0 : index
    %41 = vector.load %arg4[%c1_21, %c0_22, %c0_23] : memref<7x33x32xf32, #tpu.memory_space<vmem>>, vector<1x32x32xf32>
    %42 = vector.shape_cast %41 : vector<1x32x32xf32> to vector<32x32xf32>
    %43 = arith.truncf %42 : vector<32x32xf32> to vector<32x32xbf16>
    %44 = arith.truncf %40 : vector<128x32xf32> to vector<128x32xbf16>
    %cst_24 = arith.constant dense<0.000000e+00> : vector<128x32xf32>
    %45 = tpu.matmul %44, %43, %cst_24 {dimension_numbers = #tpu.dot_dimension_numbers<[1], [0], [0], [1], [0, 0, 1, 1], [], []>} : vector<128x32xbf16>, vector<32x32xbf16>, vector<128x32xf32> -> vector<128x32xf32>
    %c3 = arith.constant 3 : index
    %c0_25 = arith.constant 0 : index
    %46 = vector.load %arg5[%c3, %c0_25] : memref<9x32xf32, #tpu.memory_space<vmem>>, vector<1x32xf32>
    %47 = vector.broadcast %46 : vector<1x32xf32> to vector<128x32xf32>
    %48 = arith.addf %45, %47 : vector<128x32xf32>
    %cst_26 = arith.constant 0.000000e+00 : f32
    %49 = vector.broadcast %cst_26 : f32 to vector<128x32xf32>
    %50 = arith.maximumf %48, %49 : vector<128x32xf32>
    %c2_27 = arith.constant 2 : index
    %c0_28 = arith.constant 0 : index
    %c0_29 = arith.constant 0 : index
    %51 = vector.load %arg4[%c2_27, %c0_28, %c0_29] : memref<7x33x32xf32, #tpu.memory_space<vmem>>, vector<1x32x32xf32>
    %52 = vector.shape_cast %51 : vector<1x32x32xf32> to vector<32x32xf32>
    %53 = arith.truncf %52 : vector<32x32xf32> to vector<32x32xbf16>
    %54 = arith.truncf %50 : vector<128x32xf32> to vector<128x32xbf16>
    %cst_30 = arith.constant dense<0.000000e+00> : vector<128x32xf32>
    %55 = tpu.matmul %54, %53, %cst_30 {dimension_numbers = #tpu.dot_dimension_numbers<[1], [0], [0], [1], [0, 0, 1, 1], [], []>} : vector<128x32xbf16>, vector<32x32xbf16>, vector<128x32xf32> -> vector<128x32xf32>
    %c4 = arith.constant 4 : index
    %c0_31 = arith.constant 0 : index
    %56 = vector.load %arg5[%c4, %c0_31] : memref<9x32xf32, #tpu.memory_space<vmem>>, vector<1x32xf32>
    %57 = vector.broadcast %56 : vector<1x32xf32> to vector<128x32xf32>
    %58 = arith.addf %55, %57 : vector<128x32xf32>
    %cst_32 = arith.constant 0.000000e+00 : f32
    %59 = vector.broadcast %cst_32 : f32 to vector<128x32xf32>
    %60 = arith.maximumf %58, %59 : vector<128x32xf32>
    %c3_33 = arith.constant 3 : index
    %c0_34 = arith.constant 0 : index
    %c0_35 = arith.constant 0 : index
    %61 = vector.load %arg4[%c3_33, %c0_34, %c0_35] : memref<7x33x32xf32, #tpu.memory_space<vmem>>, vector<1x32x32xf32>
    %62 = vector.shape_cast %61 : vector<1x32x32xf32> to vector<32x32xf32>
    %63 = arith.truncf %62 : vector<32x32xf32> to vector<32x32xbf16>
    %64 = arith.truncf %60 : vector<128x32xf32> to vector<128x32xbf16>
    %cst_36 = arith.constant dense<0.000000e+00> : vector<128x32xf32>
    %65 = tpu.matmul %64, %63, %cst_36 {dimension_numbers = #tpu.dot_dimension_numbers<[1], [0], [0], [1], [0, 0, 1, 1], [], []>} : vector<128x32xbf16>, vector<32x32xbf16>, vector<128x32xf32> -> vector<128x32xf32>
    %c5 = arith.constant 5 : index
    %c0_37 = arith.constant 0 : index
    %66 = vector.load %arg5[%c5, %c0_37] : memref<9x32xf32, #tpu.memory_space<vmem>>, vector<1x32xf32>
    %67 = vector.broadcast %66 : vector<1x32xf32> to vector<128x32xf32>
    %68 = arith.addf %65, %67 : vector<128x32xf32>
    %c3_38 = arith.constant 3 : index
    %c32_39 = arith.constant 32 : index
    %c0_40 = arith.constant 0 : index
    %69 = vector.load %arg4[%c3_38, %c32_39, %c0_40] : memref<7x33x32xf32, #tpu.memory_space<vmem>>, vector<1x1x32xf32>
    %70 = vector.shape_cast %69 : vector<1x1x32xf32> to vector<1x32xf32>
    %71 = vector.broadcast %0 : vector<128x1xf32> to vector<128x32xf32>
    %72 = vector.broadcast %70 : vector<1x32xf32> to vector<128x32xf32>
    %73 = arith.mulf %71, %72 : vector<128x32xf32>
    %74 = arith.addf %68, %73 : vector<128x32xf32>
    %cst_41 = arith.constant 0.000000e+00 : f32
    %75 = vector.broadcast %cst_41 : f32 to vector<128x32xf32>
    %76 = arith.maximumf %74, %75 : vector<128x32xf32>
    %77 = arith.mulf %76, %74 : vector<128x32xf32>
    %c4_42 = arith.constant 4 : index
    %c0_43 = arith.constant 0 : index
    %c0_44 = arith.constant 0 : index
    %78 = vector.load %arg4[%c4_42, %c0_43, %c0_44] : memref<7x33x32xf32, #tpu.memory_space<vmem>>, vector<1x32x32xf32>
    %79 = vector.shape_cast %78 : vector<1x32x32xf32> to vector<32x32xf32>
    %80 = arith.truncf %79 : vector<32x32xf32> to vector<32x32xbf16>
    %81 = arith.truncf %77 : vector<128x32xf32> to vector<128x32xbf16>
    %cst_45 = arith.constant dense<0.000000e+00> : vector<128x32xf32>
    %82 = tpu.matmul %81, %80, %cst_45 {dimension_numbers = #tpu.dot_dimension_numbers<[1], [0], [0], [1], [0, 0, 1, 1], [], []>} : vector<128x32xbf16>, vector<32x32xbf16>, vector<128x32xf32> -> vector<128x32xf32>
    %c6 = arith.constant 6 : index
    %c0_46 = arith.constant 0 : index
    %83 = vector.load %arg5[%c6, %c0_46] : memref<9x32xf32, #tpu.memory_space<vmem>>, vector<1x32xf32>
    %84 = vector.broadcast %83 : vector<1x32xf32> to vector<128x32xf32>
    %85 = arith.addf %82, %84 : vector<128x32xf32>
    %cst_47 = arith.constant 0.000000e+00 : f32
    %86 = vector.broadcast %cst_47 : f32 to vector<128x32xf32>
    %87 = arith.maximumf %85, %86 : vector<128x32xf32>
    %c5_48 = arith.constant 5 : index
    %c0_49 = arith.constant 0 : index
    %c0_50 = arith.constant 0 : index
    %88 = vector.load %arg4[%c5_48, %c0_49, %c0_50] : memref<7x33x32xf32, #tpu.memory_space<vmem>>, vector<1x32x32xf32>
    %89 = vector.shape_cast %88 : vector<1x32x32xf32> to vector<32x32xf32>
    %90 = arith.truncf %89 : vector<32x32xf32> to vector<32x32xbf16>
    %91 = arith.truncf %87 : vector<128x32xf32> to vector<128x32xbf16>
    %cst_51 = arith.constant dense<0.000000e+00> : vector<128x32xf32>
    %92 = tpu.matmul %91, %90, %cst_51 {dimension_numbers = #tpu.dot_dimension_numbers<[1], [0], [0], [1], [0, 0, 1, 1], [], []>} : vector<128x32xbf16>, vector<32x32xbf16>, vector<128x32xf32> -> vector<128x32xf32>
    %c7 = arith.constant 7 : index
    %c0_52 = arith.constant 0 : index
    %93 = vector.load %arg5[%c7, %c0_52] : memref<9x32xf32, #tpu.memory_space<vmem>>, vector<1x32xf32>
    %94 = vector.broadcast %93 : vector<1x32xf32> to vector<128x32xf32>
    %95 = arith.addf %92, %94 : vector<128x32xf32>
    %cst_53 = arith.constant 0.000000e+00 : f32
    %96 = vector.broadcast %cst_53 : f32 to vector<128x32xf32>
    %97 = arith.maximumf %95, %96 : vector<128x32xf32>
    %c6_54 = arith.constant 6 : index
    %c0_55 = arith.constant 0 : index
    %c0_56 = arith.constant 0 : index
    %98 = vector.load %arg4[%c6_54, %c0_55, %c0_56] : memref<7x33x32xf32, #tpu.memory_space<vmem>>, vector<1x32x4xf32>
    %99 = vector.shape_cast %98 : vector<1x32x4xf32> to vector<32x4xf32>
    %100 = arith.truncf %99 : vector<32x4xf32> to vector<32x4xbf16>
    %101 = arith.truncf %97 : vector<128x32xf32> to vector<128x32xbf16>
    %cst_57 = arith.constant dense<0.000000e+00> : vector<128x4xf32>
    %102 = tpu.matmul %101, %100, %cst_57 {dimension_numbers = #tpu.dot_dimension_numbers<[1], [0], [0], [1], [0, 0, 1, 1], [], []>} : vector<128x32xbf16>, vector<32x4xbf16>, vector<128x4xf32> -> vector<128x4xf32>
    %c8 = arith.constant 8 : index
    %c0_58 = arith.constant 0 : index
    %103 = vector.load %arg5[%c8, %c0_58] : memref<9x32xf32, #tpu.memory_space<vmem>>, vector<1x4xf32>
    %104 = vector.broadcast %103 : vector<1x4xf32> to vector<128x4xf32>
    %105 = arith.addf %102, %104 : vector<128x4xf32>
    %c6_59 = arith.constant 6 : index
    %c32_60 = arith.constant 32 : index
    %c0_61 = arith.constant 0 : index
    %106 = vector.load %arg4[%c6_59, %c32_60, %c0_61] : memref<7x33x32xf32, #tpu.memory_space<vmem>>, vector<1x1x4xf32>
    %107 = vector.shape_cast %106 : vector<1x1x4xf32> to vector<1x4xf32>
    %108 = vector.broadcast %0 : vector<128x1xf32> to vector<128x4xf32>
    %109 = vector.broadcast %107 : vector<1x4xf32> to vector<128x4xf32>
    %110 = arith.mulf %108, %109 : vector<128x4xf32>
    %111 = arith.addf %105, %110 : vector<128x4xf32>
    %c0_62 = arith.constant 0 : index
    %c0_63 = arith.constant 0 : index
    %112 = vector.load %arg6[%c0_62, %c0_63] : memref<128x4xf32, #tpu.memory_space<vmem>>, vector<128x4xf32>
    tpu.vector_store %arg6[%c0_62, %c0_63], %111 {strides = array<i32>} : memref<128x4xf32, #tpu.memory_space<vmem>>, vector<128x4xf32>,
    return
  }
  func.func @transform_0(%arg0: i32) -> (i32, i32) {
    %c0_i32 = arith.constant 0 : i32
    %c0_i32_0 = arith.constant 0 : i32
    return %arg0, %c0_i32 : i32, i32
  }
  func.func @transform_1(%arg0: i32) -> (i32, i32) {
    %c0_i32 = arith.constant 0 : i32
    %c0_i32_0 = arith.constant 0 : i32
    return %arg0, %c0_i32 : i32, i32
  }
  func.func @transform_2(%arg0: i32) -> (i32, i32) {
    %c0_i32 = arith.constant 0 : i32
    %c0_i32_0 = arith.constant 0 : i32
    %c0_i32_1 = arith.constant 0 : i32
    return %c0_i32, %c0_i32_0 : i32, i32
  }
  func.func @transform_3(%arg0: i32) -> (i32, i32, i32) {
    %c0_i32 = arith.constant 0 : i32
    %c0_i32_0 = arith.constant 0 : i32
    %c0_i32_1 = arith.constant 0 : i32
    %c0_i32_2 = arith.constant 0 : i32
    return %c0_i32, %c0_i32_0, %c0_i32_1 : i32, i32, i32
  }
  func.func @transform_4(%arg0: i32) -> (i32, i32) {
    %c0_i32 = arith.constant 0 : i32
    %c0_i32_0 = arith.constant 0 : i32
    %c0_i32_1 = arith.constant 0 : i32
    return %c0_i32, %c0_i32_0 : i32, i32
  }
  func.func @transform_5(%arg0: i32) -> (i32, i32) {
    %c0_i32 = arith.constant 0 : i32
    %c0_i32_0 = arith.constant 0 : i32
    return %arg0, %c0_i32 : i32, i32
  }
}

</mosaic_0001>

<bundles_post_ra>
// kernel: toy_conditional_model.2
= control target key start
LH: loop header
LB: loop body
LE: loop exit
PB: predicated region body
PF: predicated region fallthrough
CT: control target
= control target key end

     0   :  { %s759_s15 = smov 0   ;;  %s920_s0 = inlined_call_operand.vmem [shape: f32[256,4], index: 0, kind: input, shape index: {}]   ;;  %s921_s1 = inlined_call_operand.vmem [shape: f32[256,1], index: 1, kind: input, shape index: {}]   ;;  %s922_s2 = inlined_call_operand.vmem [shape: f32[7,33,32], index: 2, kind: input, shape index: {}]   ;;  %s923_s3 = inlined_call_operand.vmem [shape: f32[9,32], index: 3, kind: input, shape index: {}]   ;;  %s924_s4 = inlined_call_operand.vmem [shape: f32[2,32], index: 4, kind: output, shape index: {}]  }
   0x1 LB: > { %s765_s16 = sadd.s32 4294967295, %s731_s15   ;;  %p664_p0 = scmp.ge.s32.totalorder %s731_s15, 1  ;;  %s731_s15 = sphi %s759_s15, %s14_s15  }
   0x2   : > { %p169_p1 = scmp.lt.s32.totalorder %s731_s15, 3 }
   0x4   : > { %p170_p2 = pnand %p664_p0, %p169_p1 }
   0x5   : > { %s665_s19 = sshll.u32 (!%p170_p2), %s765_s16, 4  ;;  %p679_p4 = scmp.ne.s32.totalorder (!%p170_p2), %s765_s16, 0 }
   0x6   : > { %173 = sbr.rel (%p170_p2) target bundleno = 282 (0x11a), region = 36  ;;  %p196_p3 = scmp.lt.s32.totalorder (!%p170_p2), %s665_s19, 31 }
   0xb   : > { %v240_v0 = vld [vmem:[%s922_s2] sm:$0xf]  ;;  %vm280_vm0 = vcmask 1041408   ;;  %v733_v2 = vmov 0   ;;  %s926_s19 = smov (!%p196_p3, %s665_s19), 31  ;;  %vm255_vm1 = vcmask 31744  }
   0xc   : > { %v241_v1 = vpack.c.bf16 %v240_v0, %v240_v0  ;;  %723 = vset.pattern.permute.xlu0 %v733_v2  ;;  %724 = vset.pattern.permute.xlu1 %v733_v2  ;;  %s666_s20 = sshll.u32 %s926_s19, 3  ;;  %v828_v51 = vld [vmem:[%s922_s2 + $0x20] ss:$0 sm:$0xff]  ;;  %vm514_vm2 = vcmask 261120   ;;  %vm605_vm3 = vcmask 1040384  }
   0xd   : > { %s776_s23 = scalar_lea.vmem %s920_s0, %s666_s20  ;;  %s790_s26 = scalar_lea.vmem %s921_s1, %s666_s20  ;;  %v833_v52 = vld [vmem:[%s923_s3] ss:$0 sm:$0xff] }
   0xe   : > { %712 = vmatprep.subr.msk.bf16.mxu0 %vm280_vm0, %v241_v1  ;;  %713 = vmatprep.subr.msk.bf16.mxu1 %vm280_vm0, %v241_v1  ;;  %v282_v3 = vsel %vm280_vm0, %v241_v1, 0  ;;  %v208_v4 = vld [vmem:[%s776_s23] sm:$0xff]  ;;  %v209_v5 = vld [vmem:[%s776_s23 + $0x8] sm:$0xff]  ;;  %v210_v9 = vld [vmem:[%s776_s23 + $0x10] sm:$0xff] }
   0xf   : > { %693 = vmatpush3.bf16.msra.mxu0 %v282_v3  ;;  %711 = vmatpush3.bf16.msra.mxu1 %v282_v3  ;;  %v216_v6 = vld [vmem:[%s776_s23 + $0x40] sm:$0xff]  ;;  %v242_v7 = vpack.c.bf16 %v209_v5, %v208_v4  ;;  %v217_v8 = vld [vmem:[%s776_s23 + $0x48] sm:$0xff]  ;;  %v211_v10 = vld [vmem:[%s776_s23 + $0x18] sm:$0xff] }
  0x10   : > { %v246_v11 = vpack.c.bf16 %v217_v8, %v216_v6  ;;  %v243_v12 = vpack.c.bf16 %v211_v10, %v210_v9  ;;  %v218_v13 = vld [vmem:[%s776_s23 + $0x50] sm:$0xff]  ;;  %v219_v14 = vld [vmem:[%s776_s23 + $0x58] sm:$0xff]  ;;  %v212_v15 = vld [vmem:[%s776_s23 + $0x20] sm:$0xff] }
  0x11   : > { %694 = vmatprep.mubr.msk.bf16.mxu0 %vm255_vm1, %v242_v7  ;;  %v247_v16 = vpack.c.bf16 %v219_v14, %v218_v13  ;;  %v213_v17 = vld [vmem:[%s776_s23 + $0x28] sm:$0xff]  ;;  %v220_v18 = vld [vmem:[%s776_s23 + $0x60] sm:$0xff]  ;;  %v214_v22 = vld [vmem:[%s776_s23 + $0x30] sm:$0xff] }
  0x12   : > { %v221_v19 = vld [vmem:[%s776_s23 + $0x68] sm:$0xff]  ;;  %702 = vmatprep.mubr.msk.bf16.mxu1 %vm255_vm1, %v246_v11  ;;  %695 = vmatmul.mubr.msk.bf16.vlgmr.msra.gmra.mxu0 %vm255_vm1, %v243_v12  ;;  %v244_v20 = vpack.c.bf16 %v213_v17, %v212_v15  ;;  %v215_v23 = vld [vmem:[%s776_s23 + $0x38] sm:$0xff]  ;;  %v224_v24 = vld [vmem:[%s790_s26] sm:$0xff] }
  0x13   : > { %v248_v21 = vpack.c.bf16 %v221_v19, %v220_v18  ;;  %703 = vmatmul.mubr.msk.bf16.vlgmr.msra.gmra.mxu1 %vm255_vm1, %v247_v16  ;;  %v226_v25 = vld [vmem:[%s790_s26 + $0x10] sm:$0xff]  ;;  %v223_v27 = vld [vmem:[%s776_s23 + $0x78] sm:$0xff]  ;;  %384 = vperm.xlu0 %723, %v224_v24   ;;  %v245_v28 = vpack.c.bf16 %v215_v23, %v214_v22  ;;  %v225_v29 = vld [vmem:[%s790_s26 + $0x8] sm:$0xff] }
  0x14   : > { %698 = vmatprep.mubr.msk.bf16.mxu0 %vm255_vm1, %v244_v20  ;;  %v222_v26 = vld [vmem:[%s776_s23 + $0x70] sm:$0xff]  ;;  %394 = vperm.xlu1 %724, %v226_v25   ;;  %v227_v30 = vld [vmem:[%s790_s26 + $0x18] sm:$0xff]  ;;  %v228_v32 = vld [vmem:[%s790_s26 + $0x20] sm:$0xff] }
  0x15   : > { %706 = vmatprep.mubr.msk.bf16.mxu1 %vm255_vm1, %v248_v21  ;;  %v249_v31 = vpack.c.bf16 %v223_v27, %v222_v26  ;;  %v229_v33 = vld [vmem:[%s790_s26 + $0x28] sm:$0xff]  ;;  %v230_v34 = vld [vmem:[%s790_s26 + $0x30] sm:$0xff]  ;;  %v231_v35 = vld [vmem:[%s790_s26 + $0x38] sm:$0xff] }
  0x16   : > { %v232_v36 = vld [vmem:[%s790_s26 + $0x40] sm:$0xff]  ;;  %v233_v37 = vld [vmem:[%s790_s26 + $0x48] sm:$0xff]  ;;  %v234_v38 = vld [vmem:[%s790_s26 + $0x50] sm:$0xff] }
  0x17   : > { %389 = vperm.xlu0 %723, %v225_v29   ;;  %v235_v39 = vld [vmem:[%s790_s26 + $0x58] sm:$0xff]  ;;  %v236_v40 = vld [vmem:[%s790_s26 + $0x60] sm:$0xff]  ;;  %v237_v41 = vld [vmem:[%s790_s26 + $0x68] sm:$0xff] }
  0x18   : > { %399 = vperm.xlu1 %724, %v227_v30   ;;  %v238_v42 = vld [vmem:[%s790_s26 + $0x70] sm:$0xff]  ;;  %v239_v43 = vld [vmem:[%s790_s26 + $0x78] sm:$0xff] }
  0x1a   : > { %699 = vmatmul.mubr.msk.bf16.gmra.mxu0 %vm255_vm1, %v245_v28 }
  0x1b   : > { %707 = vmatmul.mubr.msk.bf16.gmra.mxu1 %vm255_vm1, %v249_v31  ;;  %404 = vperm.xlu0 %723, %v228_v32  }
  0x1c   : > { %409 = vperm.xlu1 %724, %v229_v33  }
  0x1f   : > { %414 = vperm.xlu0 %723, %v230_v34  }
  0x20   : > { %419 = vperm.xlu1 %724, %v231_v35  }
  0x23   : > { %424 = vperm.xlu0 %723, %v232_v36  }
  0x24   : > { %429 = vperm.xlu1 %724, %v233_v37  }
  0x27   : > { %434 = vperm.xlu0 %723, %v234_v38  }
  0x28   : > { %439 = vperm.xlu1 %724, %v235_v39  }
  0x2b   : > { %444 = vperm.xlu0 %723, %v236_v40  }
  0x2c   : > { %449 = vperm.xlu1 %724, %v237_v41  }
  0x2f   : > { %454 = vperm.xlu0 %723, %v238_v42  }
  0x30   : > { %459 = vperm.xlu1 %724, %v239_v43  }
  0x8e   : > { %v385_v44 = vpop.permute.xlu0 %384 }
  0x8f   : > { %v395_v45 = vpop.permute.xlu1 %394  ;;  %v466_v54 = vmul.f32 %v828_v51, %v385_v44 }
  0x90   : > { %v468_v59 = vmul.f32 %v828_v51, %v395_v45 }
  0x92   : > { %v390_v46 = vpop.permute.xlu0 %389 }
  0x93   : > { %v400_v47 = vpop.permute.xlu1 %399  ;;  %v467_v7 = vmul.f32 %v828_v51, %v390_v46 }
  0x94   : > { %v469_v63 = vmul.f32 %v828_v51, %v400_v47 }
  0x96   : > { %v405_v48 = vpop.permute.xlu0 %404 }
  0x97   : > { %v410_v55 = vpop.permute.xlu1 %409  ;;  %v470_v15 = vmul.f32 %v828_v51, %v405_v48 }
  0x9a   : > { %v415_v57 = vpop.permute.xlu0 %414 }
  0x9b   : > { %v420_v5 = vpop.permute.xlu1 %419  ;;  %v472_v29 = vmul.f32 %v828_v51, %v415_v57 }
  0x9c   : > { %v473_v45 = vmul.f32 %v828_v51, %v420_v5 }
  0x9e   : > { %v425_v6 = vpop.permute.xlu0 %424 }
  0x9f   : > { %v430_v20 = vpop.permute.xlu1 %429  ;;  %v474_v40 = vmul.f32 %v828_v51, %v425_v6 }
  0xa2   : > { %v435_v21 = vpop.permute.xlu0 %434 }
  0xa3   : > { %v440_v46 = vpop.permute.xlu1 %439 }
  0xa6   : > { %v445_v47 = vpop.permute.xlu0 %444 }
  0xd2   : > { %v696_v49 = vpop.f32.mrf.mxu0 }
  0xd3   : > { %v823_v50 = vpop.f32.mrf.mxu1  ;;  %v327_v60 = vadd.f32 %v696_v49, %v833_v52 }
  0xd4   : > { %v318_v53 = vpop.f32.mrf.mxu0 }
  0xd5   : > { %v319_v56 = vadd.f32 %v833_v52, %v318_v53  ;;  %v350_v61 = vpop.f32.mrf.mxu1  ;;  %v484_v3 = vadd.f32 %v468_v59, %v327_v60 }
  0xd6   : > { %v697_v58 = vpop.f32.mrf.mxu0  ;;  %v351_v42 = vadd.f32 %v833_v52, %v350_v61 }
  0xd7   : > { %v482_v0 = vadd.f32 %v466_v54, %v319_v56  ;;  %v330_v1 = vadd.f32 %v697_v58, %v833_v52  ;;  %v841_v4 = vpop.f32.mrf.mxu1  ;;  %v500_v12 = vmax.f32 %v484_v3, 0.0  ;;  %v471_v54 = vmul.f32 %v828_v51, %v410_v55 }
  0xd8   : > { %v321_v62 = vpop.f32.mrf.mxu0  ;;  %v475_v56 = vmul.f32 %v828_v51, %v430_v20 }
  0xd9   : > { %v498_v8 = vmax.f32 %v482_v0, 0.0  ;;  %v485_v9 = vadd.f32 %v469_v63, %v330_v1  ;;  %v322_v10 = vadd.f32 %v833_v52, %v321_v62  ;;  %v353_v14 = vpop.f32.mrf.mxu1  ;;  %v554_v23 = vmul.f32 %v500_v12, %v500_v12 }
  0xda   : > { %v700_v2 = vpop.f32.mrf.mxu0  ;;  %v518_v32 = vsel %vm514_vm2, %v500_v12, 0.0  ;;  %v354_v57 = vadd.f32 %v833_v52, %v353_v14  ;;  %v476_v63 = vmul.f32 %v828_v51, %v435_v21  ;;  %v359_v0 = vadd.f32 %v823_v50, %v833_v52  ;;  %v450_v12 = vpop.permute.xlu1 %449 }
  0xdb   : > { %v483_v13 = vadd.f32 %v467_v7, %v322_v10  ;;  %v552_v17 = vmul.f32 %v498_v8, %v498_v8  ;;  %v501_v18 = vmax.f32 %v485_v9, 0.0  ;;  %v515_v24 = vsel %vm514_vm2, %v498_v8, 0.0  ;;  %v849_v27 = vpop.f32.mrf.mxu1 }
  0xdc   : > { %v334_v11 = vpop.f32.mrf.mxu0  ;;  %v343_v31 = vadd.f32 %v700_v2, %v833_v52  ;;  %v571_v41 = vsel %vm514_vm2, %v554_v23, 0.0  ;;  %v490_v1 = vadd.f32 %v474_v40, %v351_v42  ;;  %v477_v7 = vmul.f32 %v828_v51, %v440_v46 }
  0xdd   : > { %v335_v16 = vadd.f32 %v833_v52, %v334_v11  ;;  %v499_v19 = vmax.f32 %v483_v13, 0.0  ;;  %v568_v33 = vsel %vm514_vm2, %v552_v17, 0.0  ;;  %v555_v34 = vmul.f32 %v501_v18, %v501_v18  ;;  %v366_v43 = vpop.f32.mrf.mxu1  ;;  %v455_v13 = vpop.permute.xlu0 %454 }
  0xde   : > { %v701_v28 = vpop.f32.mrf.mxu0  ;;  %v520_v48 = vsel %vm514_vm2, %v501_v18, 0.0  ;;  %v488_v53 = vadd.f32 %v472_v29, %v343_v31  ;;  %v362_v8 = vadd.f32 %v841_v4, %v833_v52  ;;  %v491_v9 = vadd.f32 %v475_v56, %v354_v57 }
  0xdf   : > { %v486_v22 = vadd.f32 %v470_v15, %v335_v16  ;;  %v516_v25 = vsel %vm514_vm2, %v499_v19, 0.0  ;;  %v553_v26 = vmul.f32 %v499_v19, %v499_v19  ;;  %v346_v39 = vadd.f32 %v701_v28, %v833_v52  ;;  %v709_v3 = vpop.f32.mrf.mxu1 }
  0xe0   : > { %v517_v30 = vadd.f32 %v516_v25, %v515_v24  ;;  %v337_v44 = vpop.f32.mrf.mxu0  ;;  %v573_v59 = vsel %vm514_vm2, %v555_v34, 0.0  ;;  %v504_v55 = vmax.f32 %v488_v53, 0.0  ;;  %v478_v11 = vmul.f32 %v828_v51, %v445_v47 }
  0xe1   : > { %v569_v35 = vsel %vm514_vm2, %v553_v26, 0.0  ;;  %v502_v38 = vmax.f32 %v486_v22, 0.0  ;;  %v489_v61 = vadd.f32 %v473_v45, %v346_v39  ;;  %v338_v62 = vadd.f32 %v833_v52, %v337_v44  ;;  %v369_v20 = vpop.f32.mrf.mxu1 }
  0xe2   : > { %v519_v36 = vadd.f32 %v518_v32, %v517_v30  ;;  %v570_v37 = vadd.f32 %v569_v35, %v568_v33  ;;  %v492_v16 = vadd.f32 %v476_v63, %v359_v0  ;;  %v479_v17 = vmul.f32 %v828_v51, %v450_v12 }
  0xe3   : > { %v556_v60 = vmul.f32 %v502_v38, %v502_v38  ;;  %v522_v5 = vsel %vm514_vm2, %v502_v38, 0.0  ;;  %v487_v6 = vadd.f32 %v471_v54, %v338_v62  ;;  %v505_v14 = vmax.f32 %v489_v61, 0.0 }
  0xe4   : > { %v572_v49 = vadd.f32 %v571_v41, %v570_v37  ;;  %v521_v58 = vadd.f32 %v520_v48, %v519_v36  ;;  %v506_v18 = vmax.f32 %v490_v1, 0.0  ;;  %v558_v21 = vmul.f32 %v504_v55, %v504_v55  ;;  %v460_v37 = vpop.permute.xlu1 %459 }
  0xe5   : > { %v575_v50 = vsel %vm514_vm2, %v556_v60, 0.0  ;;  %v503_v15 = vmax.f32 %v487_v6, 0.0  ;;  %v367_v22 = vadd.f32 %v833_v52, %v366_v43  ;;  %v480_v24 = vmul.f32 %v828_v51, %v455_v13 }
  0xe6   : > { %v574_v2 = vadd.f32 %v573_v59, %v572_v49  ;;  %v523_v10 = vadd.f32 %v522_v5, %v521_v58  ;;  %v493_v25 = vadd.f32 %v477_v7, %v362_v8  ;;  %v507_v26 = vmax.f32 %v491_v9, 0.0 }
  0xe7   : > { %v524_v4 = vsel %vm514_vm2, %v503_v15, 0.0  ;;  %v557_v23 = vmul.f32 %v503_v15, %v503_v15  ;;  %v526_v29 = vsel %vm514_vm2, %v504_v55, 0.0  ;;  %v559_v30 = vmul.f32 %v505_v14, %v505_v14 }
  0xe8   : > { %v576_v19 = vadd.f32 %v575_v50, %v574_v2  ;;  %v525_v28 = vadd.f32 %v524_v4, %v523_v10  ;;  %v370_v32 = vadd.f32 %v833_v52, %v369_v20  ;;  %v508_v33 = vmax.f32 %v492_v16, 0.0 }
  0xe9   : > { %v577_v31 = vsel %vm514_vm2, %v557_v23, 0.0  ;;  %v560_v34 = vmul.f32 %v506_v18, %v506_v18  ;;  %v579_v38 = vsel %vm514_vm2, %v558_v21, 0.0  ;;  %v375_v39 = vadd.f32 %v849_v27, %v833_v52 }
  0xea   : > { %v527_v35 = vadd.f32 %v526_v29, %v525_v28  ;;  %v578_v36 = vadd.f32 %v577_v31, %v576_v19  ;;  %v494_v40 = vadd.f32 %v478_v11, %v367_v22  ;;  %v528_v41 = vsel %vm514_vm2, %v505_v14, 0.0 }
  0xeb   : > { %v530_v42 = vsel %vm514_vm2, %v506_v18, 0.0  ;;  %v509_v43 = vmax.f32 %v493_v25, 0.0  ;;  %v561_v46 = vmul.f32 %v507_v26, %v507_v26  ;;  %v581_v47 = vsel %vm514_vm2, %v559_v30, 0.0 }
  0xec   : > { %v529_v44 = vadd.f32 %v528_v41, %v527_v35  ;;  %v580_v45 = vadd.f32 %v579_v38, %v578_v36  ;;  %v378_v48 = vadd.f32 %v709_v3, %v833_v52  ;;  %v495_v49 = vadd.f32 %v479_v17, %v370_v32 }
  0xed   : > { %v562_v53 = vmul.f32 %v508_v33, %v508_v33  ;;  %v481_v54 = vmul.f32 %v828_v51, %v460_v37  ;;  %v583_v27 = vsel %vm514_vm2, %v560_v34, 0.0  ;;  %v532_v58 = vsel %vm514_vm2, %v507_v26, 0.0 }
  0xee   : > { %v531_v56 = vadd.f32 %v530_v42, %v529_v44  ;;  %v582_v57 = vadd.f32 %v581_v47, %v580_v45  ;;  %v496_v59 = vadd.f32 %v480_v24, %v375_v39  ;;  %v510_v60 = vmax.f32 %v494_v40, 0.0 }
  0xef   : > { %v534_v61 = vsel %vm514_vm2, %v508_v33, 0.0  ;;  %v563_v0 = vmul.f32 %v509_v43, %v509_v43  ;;  %v585_v1 = vsel %vm514_vm2, %v561_v46, 0.0  ;;  %v497_v52 = vadd.f32 %v481_v54, %v378_v48 }
  0xf0   : > { %v584_v62 = vadd.f32 %v583_v27, %v582_v57  ;;  %v533_v63 = vadd.f32 %v532_v58, %v531_v56  ;;  %v511_v2 = vmax.f32 %v495_v49, 0.0  ;;  %v587_v51 = vsel %vm514_vm2, %v562_v53, 0.0 }
  0xf1   : > { %v536_v5 = vsel %vm514_vm2, %v509_v43, 0.0  ;;  %v512_v6 = vmax.f32 %v496_v59, 0.0  ;;  %v564_v7 = vmul.f32 %v510_v60, %v510_v60  ;;  %v589_v10 = vsel %vm514_vm2, %v563_v0, 0.0 }
  0xf2   : > { %v535_v3 = vadd.f32 %v534_v61, %v533_v63  ;;  %v586_v55 = vadd.f32 %v585_v1, %v584_v62  ;;  %v538_v11 = vsel %vm514_vm2, %v510_v60, 0.0  ;;  %v513_v12 = vmax.f32 %v497_v52, 0.0 }
  0xf3   : > { %v565_v13 = vmul.f32 %v511_v2, %v511_v2  ;;  %v566_v15 = vmul.f32 %v512_v6, %v512_v6  ;;  %v591_v16 = vsel %vm514_vm2, %v564_v7, 0.0  ;;  %v540_v17 = vsel %vm514_vm2, %v511_v2, 0.0 }
  0xf4   : > { %v537_v8 = vadd.f32 %v536_v5, %v535_v3  ;;  %v588_v9 = vadd.f32 %v587_v51, %v586_v55  ;;  %v542_v20 = vsel %vm514_vm2, %v512_v6, 0.0  ;;  %v567_v21 = vmul.f32 %v513_v12, %v513_v12 }
  0xf5   : > { %v593_v22 = vsel %vm514_vm2, %v565_v13, 0.0  ;;  %v595_v24 = vsel %vm514_vm2, %v566_v15, 0.0  ;;  %v544_v25 = vsel %vm514_vm2, %v513_v12, 0.0 }
  0xf6   : > { %v539_v50 = vadd.f32 %v538_v11, %v537_v8  ;;  %v590_v14 = vadd.f32 %v589_v10, %v588_v9  ;;  %v597_v29 = vsel %vm514_vm2, %v567_v21, 0.0 }
  0xf8   : > { %v541_v18 = vadd.f32 %v540_v17, %v539_v50  ;;  %v592_v19 = vadd.f32 %v591_v16, %v590_v14 }
  0xfa   : > { %v543_v4 = vadd.f32 %v542_v20, %v541_v18  ;;  %v594_v23 = vadd.f32 %v593_v22, %v592_v19 }
  0xfc   : > { %v545_v26 = vadd.f32 %v544_v25, %v543_v4  ;;  %v596_v28 = vadd.f32 %v595_v24, %v594_v23 }
  0xfe   : > { %v546_v30 = vrot.slane %v545_v26, 4  ;;  %v598_v31 = vadd.f32 %v597_v29, %v596_v28 }
 0x100   : > { %v547_v32 = vadd.f32 %v546_v30, %v545_v26  ;;  %v599_v33 = vrot.slane %v598_v31, 4 }
 0x102   : > { %v548_v34 = vrot.slane %v547_v32, 2  ;;  %v600_v35 = vadd.f32 %v599_v33, %v598_v31 }
 0x104   : > { %v549_v36 = vadd.f32 %v548_v34, %v547_v32  ;;  %v601_v37 = vrot.slane %v600_v35, 2 }
 0x106   : > { %v550_v38 = vrot.slane %v549_v36, 1  ;;  %v602_v39 = vadd.f32 %v601_v37, %v600_v35 }
 0x108   : > { %v603_v40 = vrot.slane %v602_v39, 1  ;;  %v551_v41 = vadd.f32 %v550_v38, %v549_v36  ;;  %610 = sbr.rel (%p679_p4) target bundleno = 271 (0x10f), region = 40 }
 0x10a   : > { %v604_v42 = vadd.f32 %v603_v40, %v602_v39 }
 0x10c   : > { %v606_v43 = vsel %vm605_vm3, %v551_v41, %v604_v42 }
 0x10d   : > { %vm611_vm4 = vcmask 254976  }
 0x10e   : > { %612 = vst.msk [vmem:[%s924_s4] sm:$0x3] %vm611_vm4, %v606_v43 }
 0x10f PF: > { %p680_p5 = scmp.eq.s32.totalorder %s765_s16, 0 }
 0x111   : > { %616 = sbr.rel (%p680_p5) target bundleno = 282 (0x11a), region = 44 }
 0x116   : > { %v617_v44 = vld [vmem:[%s924_s4] sm:$0x3]  ;;  %vm619_vm5 = vcmask 254976  }
 0x117   : > { %v618_v45 = vadd.f32 %v617_v44, %v606_v43 }
 0x119   : > { %620 = vst.msk [vmem:[%s924_s4] sm:$0x3] %vm619_vm5, %v618_v45 }
 0x11a PF: > { %s14_s15 = sadd.s32 1, %s731_s15  }
 0x11b   : > { %p11_p6 = scmp.ge.s32.totalorder %s14_s15, 4  }
 0x11d   :  { %13 = sbr.rel (!%p11_p6) target bundleno = 1 (0x1), region = 73 }

// kernel: toy_conditional_model.3
= control target key start
LH: loop header
LB: loop body
LE: loop exit
PB: predicated region body
PF: predicated region fallthrough
CT: control target
= control target key end

     0   :  { %s2119_s18 = smov 0   ;;  %s2653_s0 = inlined_call_operand.vmem [shape: f32[256,4], index: 0, kind: input, shape index: {}]   ;;  %s2654_s1 = inlined_call_operand.vmem [shape: f32[256,1], index: 1, kind: input, shape index: {}]   ;;  %s2655_s2 = inlined_call_operand.vmem [shape: f32[2,32], index: 2, kind: input, shape index: {}]   ;;  %s2656_s3 = inlined_call_operand.vmem [shape: f32[7,33,32], index: 3, kind: input, shape index: {}]   ;;  %s2657_s4 = inlined_call_operand.vmem [shape: f32[9,32], index: 4, kind: input, shape index: {}]   ;;  %s2658_s5 = inlined_call_operand.vmem [shape: f32[256,4], index: 5, kind: output, shape index: {}]  }
   0x1 LB: > { %s1749_s19 = sadd.s32 4294967295, %s2086_s18   ;;  %p1753_p0 = scmp.ge.s32.totalorder %s2086_s18, 1  ;;  %s2086_s18 = sphi %s2119_s18, %s15_s18  }
   0x2   : > { %p199_p1 = scmp.lt.s32.totalorder %s2086_s18, 3 }
   0x4   : > { %p200_p2 = pnand %p1753_p0, %p199_p1 }
   0x5   : > { %s1754_s22 = sshll.u32 (!%p200_p2), %s1749_s19, 4 }
   0x6   : > { %203 = sbr.rel (%p200_p2) target bundleno = 1498 (0x5da), region = 40  ;;  %p233_p3 = scmp.lt.s32.totalorder (!%p200_p2), %s1754_s22, 31 }
   0xb   : > { %v283_v0 = vld [vmem:[%s2656_s3] sm:$0xf]  ;;  %vm323_vm0 = vcmask 1041408   ;;  %v2088_v2 = vmov 0   ;;  %s2660_s22 = smov (!%p233_p3, %s1754_s22), 31  ;;  %vm298_vm1 = vcmask 31744  }
   0xc   : > { %v284_v1 = vpack.c.bf16 %v283_v0, %v283_v0  ;;  %2076 = vset.pattern.permute.xlu0 %v2088_v2  ;;  %2077 = vset.pattern.permute.xlu1 %v2088_v2  ;;  %s2130_s23 = sshll.u32 %s2660_s22, 3  ;;  %v1774_v44 = vld [vmem:[%s2656_s3 + $0x38] sm:$0xff]  ;;  %v1775_v45 = vld [vmem:[%s2656_s3 + $0x40] sm:$0xff]  ;;  %v1772_v47 = vld [vmem:[%s2656_s3 + $0x28] sm:$0xff]  ;;  %vm668_vm2 = vcmask 261120  }
   0xd   : > { %s2136_s26 = scalar_lea.vmem %s2653_s0, %s2130_s23  ;;  %s2151_s29 = scalar_lea.vmem %s2654_s1, %s2130_s23  ;;  %v654_v46 = vpack.c.bf16 %v1775_v45, %v1774_v44  ;;  %v1773_v48 = vld [vmem:[%s2656_s3 + $0x30] sm:$0xff]  ;;  %v1787_v50 = vld [vmem:[%s2656_s3 + $0x60] sm:$0xff]  ;;  %v1788_v51 = vld [vmem:[%s2656_s3 + $0x68] sm:$0xff] }
   0xe   : > { %2065 = vmatprep.subr.msk.bf16.mxu0 %vm323_vm0, %v284_v1  ;;  %2066 = vmatprep.subr.msk.bf16.mxu1 %vm323_vm0, %v284_v1  ;;  %v325_v3 = vsel %vm323_vm0, %v284_v1, 0  ;;  %v267_v4 = vld [vmem:[%s2136_s26] sm:$0xff]  ;;  %v268_v5 = vld [vmem:[%s2136_s26 + $0x8] sm:$0xff]  ;;  %v269_v9 = vld [vmem:[%s2136_s26 + $0x10] sm:$0xff]  ;;  %v653_v49 = vpack.c.bf16 %v1773_v48, %v1772_v47  ;;  %v812_v52 = vpack.c.bf16 %v1788_v51, %v1787_v50  ;;  %s2571_s14 = scalar_lea.vmem %s2658_s5, %s2130_s23 }
   0xf   : > { %1926 = vmatpush3.bf16.msra.mxu0 %v325_v3  ;;  %2064 = vmatpush3.bf16.msra.mxu1 %v325_v3  ;;  %v275_v6 = vld [vmem:[%s2136_s26 + $0x40] sm:$0xff]  ;;  %v285_v7 = vpack.c.bf16 %v268_v5, %v267_v4  ;;  %v276_v8 = vld [vmem:[%s2136_s26 + $0x48] sm:$0xff]  ;;  %v270_v10 = vld [vmem:[%s2136_s26 + $0x18] sm:$0xff] }
  0x10   : > { %v289_v11 = vpack.c.bf16 %v276_v8, %v275_v6  ;;  %v286_v12 = vpack.c.bf16 %v270_v10, %v269_v9  ;;  %v277_v13 = vld [vmem:[%s2136_s26 + $0x50] sm:$0xff]  ;;  %v278_v14 = vld [vmem:[%s2136_s26 + $0x58] sm:$0xff]  ;;  %v271_v15 = vld [vmem:[%s2136_s26 + $0x20] sm:$0xff]  ;;  %1943 = vmatprep.subr.bf16.mxu1 %v654_v46  ;;  %1963 = vmatprep.subr.bf16.mxu0 %v812_v52 }
  0x11   : > { %1927 = vmatprep.mubr.msk.bf16.mxu0 %vm298_vm1, %v285_v7  ;;  %v290_v16 = vpack.c.bf16 %v278_v14, %v277_v13  ;;  %v272_v17 = vld [vmem:[%s2136_s26 + $0x28] sm:$0xff]  ;;  %v279_v18 = vld [vmem:[%s2136_s26 + $0x60] sm:$0xff]  ;;  %v273_v22 = vld [vmem:[%s2136_s26 + $0x30] sm:$0xff]  ;;  %v564_v7 = vlaneseq }
  0x12   : > { %v280_v19 = vld [vmem:[%s2136_s26 + $0x68] sm:$0xff]  ;;  %1935 = vmatprep.mubr.msk.bf16.mxu1 %vm298_vm1, %v289_v11  ;;  %1928 = vmatmul.mubr.msk.bf16.vlgmr.msra.gmra.mxu0 %vm298_vm1, %v286_v12  ;;  %v287_v20 = vpack.c.bf16 %v272_v17, %v271_v15  ;;  %v274_v23 = vld [vmem:[%s2136_s26 + $0x38] sm:$0xff]  ;;  %v251_v24 = vld [vmem:[%s2151_s29] sm:$0xff] }
  0x13   : > { %v291_v21 = vpack.c.bf16 %v280_v19, %v279_v18  ;;  %1936 = vmatmul.mubr.msk.bf16.vlgmr.msra.gmra.mxu1 %vm298_vm1, %v290_v16  ;;  %v253_v25 = vld [vmem:[%s2151_s29 + $0x10] sm:$0xff]  ;;  %v282_v27 = vld [vmem:[%s2136_s26 + $0x78] sm:$0xff]  ;;  %427 = vperm.xlu0 %2076, %v251_v24   ;;  %v288_v28 = vpack.c.bf16 %v274_v23, %v273_v22  ;;  %v252_v29 = vld [vmem:[%s2151_s29 + $0x8] sm:$0xff]  ;;  %v565_v14 = vshrl.u32 %v564_v7, 7 }
  0x14   : > { %1931 = vmatprep.mubr.msk.bf16.mxu0 %vm298_vm1, %v287_v20  ;;  %v281_v26 = vld [vmem:[%s2136_s26 + $0x70] sm:$0xff]  ;;  %437 = vperm.xlu1 %2077, %v253_v25   ;;  %v254_v30 = vld [vmem:[%s2151_s29 + $0x18] sm:$0xff]  ;;  %v255_v32 = vld [vmem:[%s2151_s29 + $0x20] sm:$0xff] }
  0x15   : > { %1939 = vmatprep.mubr.msk.bf16.mxu1 %vm298_vm1, %v291_v21  ;;  %v292_v31 = vpack.c.bf16 %v282_v27, %v281_v26  ;;  %v256_v33 = vld [vmem:[%s2151_s29 + $0x28] sm:$0xff]  ;;  %v257_v34 = vld [vmem:[%s2151_s29 + $0x30] sm:$0xff]  ;;  %v258_v35 = vld [vmem:[%s2151_s29 + $0x38] sm:$0xff]  ;;  %1944 = vmatpush3.bf16.msra.mxu1 %v654_v46  ;;  %v566_v24 = vsub.s32 0, %v565_v14 }
  0x16   : > { %v259_v36 = vld [vmem:[%s2151_s29 + $0x40] sm:$0xff]  ;;  %v260_v37 = vld [vmem:[%s2151_s29 + $0x48] sm:$0xff]  ;;  %v261_v38 = vld [vmem:[%s2151_s29 + $0x50] sm:$0xff]  ;;  %1945 = vmatprep.subr.bf16.mxu1 %v653_v49  ;;  %1964 = vmatpush3.bf16.msra.mxu0 %v812_v52 }
  0x17   : > { %432 = vperm.xlu0 %2076, %v252_v29   ;;  %v262_v39 = vld [vmem:[%s2151_s29 + $0x58] sm:$0xff]  ;;  %v263_v40 = vld [vmem:[%s2151_s29 + $0x60] sm:$0xff]  ;;  %v264_v41 = vld [vmem:[%s2151_s29 + $0x68] sm:$0xff] }
  0x18   : > { %442 = vperm.xlu1 %2077, %v254_v30   ;;  %v265_v42 = vld [vmem:[%s2151_s29 + $0x70] sm:$0xff]  ;;  %v266_v43 = vld [vmem:[%s2151_s29 + $0x78] sm:$0xff]  ;;  %v557_v55 = vld [vmem:[%s2655_s2] sm:$0x1] }
  0x19   : > { %1946 = vmatpush3.bf16.msra.mxu1 %v653_v49  ;;  %v558_v56 = vmul.f32 0.00390625, %v557_v55  ;;  %v559_v57 = vld [vmem:[%s2655_s2 + $0x1] sm:$0x1]  ;;  %v2231_v8 = vld [vmem:[%s2656_s3 + $0x20] ss:$0 sm:$0xff] }
  0x1a   : > { %1932 = vmatmul.mubr.msk.bf16.gmra.mxu0 %vm298_vm1, %v288_v28  ;;  %v560_v60 = vmul.f32 0.00390625, %v559_v57  ;;  %v2236_v9 = vld [vmem:[%s2657_s4] ss:$0 sm:$0xff] }
  0x1b   : > { %1940 = vmatmul.mubr.msk.bf16.gmra.mxu1 %vm298_vm1, %v292_v31  ;;  %447 = vperm.xlu0 %2076, %v255_v32   ;;  %v561_v61 = vmul.f32 %v558_v56, %v558_v56 }
  0x1c   : > { %452 = vperm.xlu1 %2077, %v256_v33  }
  0x1d   : > { %v562_v63 = vsub.f32 %v560_v60, %v561_v61 }
  0x1f   : > { %457 = vperm.xlu0 %2076, %v257_v34   ;;  %v563_v1 = vmax.f32 %v562_v63, 0.0 }
  0x20   : > { %462 = vperm.xlu1 %2077, %v258_v35  }
  0x21   : > { %v584_v4 = vadd.f32 1e-05, %v563_v1 }
  0x23   : > { %467 = vperm.xlu0 %2076, %v259_v36   ;;  %2078 = vrsqrt.f32 %v584_v4 }
  0x24   : > { %472 = vperm.xlu1 %2077, %v260_v37  }
  0x27   : > { %477 = vperm.xlu0 %2076, %v261_v38   ;;  %v2258_v38 = vrot.slane %v558_v56, %v566_v24 }
  0x28   : > { %482 = vperm.xlu1 %2077, %v262_v39  }
  0x2b   : > { %487 = vperm.xlu0 %2076, %v263_v40  }
  0x2c   : > { %492 = vperm.xlu1 %2077, %v264_v41  }
  0x2f   : > { %497 = vperm.xlu0 %2076, %v265_v42  }
  0x30   : > { %502 = vperm.xlu1 %2077, %v266_v43   ;;  %v2079_v34 = vpop.eup %2078 }
  0x31   : > { %v2265_v45 = vrot.slane %v2079_v34, %v566_v24 }
  0x8e   : > { %v2202_v53 = vpop.permute.xlu0 %427 }
  0x8f   : > { %v2204_v54 = vpop.permute.xlu1 %437  ;;  %v509_v18 = vmul.f32 %v2231_v8, %v2202_v53 }
  0x90   : > { %v511_v11 = vmul.f32 %v2231_v8, %v2204_v54 }
  0x92   : > { %v2212_v58 = vpop.permute.xlu0 %432 }
  0x93   : > { %v2214_v59 = vpop.permute.xlu1 %442  ;;  %v510_v28 = vmul.f32 %v2231_v8, %v2212_v58 }
  0x94   : > { %v512_v19 = vmul.f32 %v2231_v8, %v2214_v59 }
  0x96   : > { %v2216_v62 = vpop.permute.xlu0 %447 }
  0x97   : > { %v2218_v0 = vpop.permute.xlu1 %452  ;;  %v513_v50 = vmul.f32 %v2231_v8, %v2216_v62 }
  0x98   : > { %v514_v51 = vmul.f32 %v2231_v8, %v2218_v0 }
  0x9a   : > { %v2220_v2 = vpop.permute.xlu0 %457 }
  0x9b   : > { %v2222_v3 = vpop.permute.xlu1 %462  ;;  %v515_v52 = vmul.f32 %v2231_v8, %v2220_v2 }
  0x9c   : > { %v516_v55 = vmul.f32 %v2231_v8, %v2222_v3 }
  0x9e   : > { %v2224_v5 = vpop.permute.xlu0 %467 }
  0x9f   : > { %v2226_v6 = vpop.permute.xlu1 %472  ;;  %v517_v41 = vmul.f32 %v2231_v8, %v2224_v5 }
  0xa0   : > { %v518_v56 = vmul.f32 %v2231_v8, %v2226_v6 }
  0xa2   : > { %v2240_v12 = vpop.permute.xlu0 %477 }
  0xa3   : > { %v2243_v16 = vpop.permute.xlu1 %482  ;;  %v519_v57 = vmul.f32 %v2231_v8, %v2240_v12 }
  0xa4   : > { %v520_v60 = vmul.f32 %v2231_v8, %v2243_v16 }
  0xa6   : > { %v2253_v29 = vpop.permute.xlu0 %487 }
  0xa7   : > { %v2256_v35 = vpop.permute.xlu1 %492 }
  0xaa   : > { %v2283_v63 = vpop.permute.xlu0 %497 }
  0xd2   : > { %v1929_v10 = vpop.f32.mrf.mxu0 }
  0xd3   : > { %v370_v13 = vadd.f32 %v1929_v10, %v2236_v9  ;;  %v1937_v15 = vpop.f32.mrf.mxu1  ;;  %v2286_v10 = vpop.permute.xlu1 %502 }
  0xd4   : > { %v361_v17 = vpop.f32.mrf.mxu0  ;;  %v402_v4 = vadd.f32 %v1937_v15, %v2236_v9  ;;  %v522_v15 = vmul.f32 %v2231_v8, %v2256_v35 }
  0xd5   : > { %v362_v20 = vadd.f32 %v2236_v9, %v361_v17  ;;  %v393_v21 = vpop.f32.mrf.mxu1  ;;  %v527_v23 = vadd.f32 %v511_v11, %v370_v13 }
  0xd6   : > { %v1930_v22 = vpop.f32.mrf.mxu0  ;;  %v394_v42 = vadd.f32 %v2236_v9, %v393_v21  ;;  %v521_v21 = vmul.f32 %v2231_v8, %v2253_v29 }
  0xd7   : > { %v373_v25 = vadd.f32 %v1930_v22, %v2236_v9  ;;  %v1938_v26 = vpop.f32.mrf.mxu1  ;;  %v525_v30 = vadd.f32 %v509_v18, %v362_v20  ;;  %v543_v37 = vmax.f32 %v527_v23, 0.0 }
  0xd8   : > { %v364_v27 = vpop.f32.mrf.mxu0  ;;  %v533_v7 = vadd.f32 %v517_v41, %v394_v42  ;;  %v405_v22 = vadd.f32 %v1938_v26, %v2236_v9 }
  0xd9   : > { %v528_v31 = vadd.f32 %v512_v19, %v373_v25  ;;  %v365_v32 = vadd.f32 %v2236_v9, %v364_v27  ;;  %v396_v33 = vpop.f32.mrf.mxu1  ;;  %v541_v46 = vmax.f32 %v525_v30, 0.0  ;;  %v570_v61 = vsub.f32 %v543_v37, %v2258_v38 }
  0xda   : > { %v1933_v36 = vpop.f32.mrf.mxu0  ;;  %v397_v48 = vadd.f32 %v2236_v9, %v396_v33  ;;  %v2301_v25 = vmul.f32 %v2231_v8, %v2283_v63  ;;  %v524_v27 = vmul.f32 %v2231_v8, %v2286_v10  ;;  %v549_v33 = vmax.f32 %v533_v7, 0.0 }
  0xdb   : > { %v526_v39 = vadd.f32 %v510_v28, %v365_v32  ;;  %v2260_v40 = vpop.f32.mrf.mxu1  ;;  %v544_v43 = vmax.f32 %v528_v31, 0.0  ;;  %v386_v13 = vadd.f32 %v1933_v36, %v2236_v9  ;;  %v568_v17 = vsub.f32 %v541_v46, %v2258_v38  ;;  %v2308_v31 = vld [vmem:[%s2657_s4 + $0x1] ss:$0 sm:$0xff] }
  0xdc   : > { %v377_v44 = vpop.f32.mrf.mxu0  ;;  %v534_v19 = vadd.f32 %v518_v56, %v397_v48  ;;  %v592_v24 = vmul.f32 %v2265_v45, %v570_v61  ;;  %v535_v32 = vadd.f32 %v519_v57, %v402_v4  ;;  %v536_v42 = vadd.f32 %v520_v60, %v405_v22  ;;  %v2322_v56 = vld [vmem:[%s2657_s4 + $0x2] ss:$0 sm:$0xff] }
  0xdd   : > { %v542_v47 = vmax.f32 %v526_v39, 0.0  ;;  %v409_v49 = vpop.f32.mrf.mxu1  ;;  %v571_v11 = vsub.f32 %v544_v43, %v2258_v38  ;;  %v378_v20 = vadd.f32 %v2236_v9, %v377_v44  ;;  %v531_v23 = vadd.f32 %v515_v52, %v386_v13 }
  0xde   : > { %v1934_v1 = vpop.f32.mrf.mxu0  ;;  %v590_v37 = vmul.f32 %v2265_v45, %v568_v17  ;;  %v550_v41 = vmax.f32 %v534_v19, 0.0  ;;  %v551_v57 = vmax.f32 %v535_v32, 0.0  ;;  %v552_v22 = vmax.f32 %v536_v42, 0.0 }
  0xdf   : > { %v1942_v14 = vpop.f32.mrf.mxu1  ;;  %v569_v18 = vsub.f32 %v542_v47, %v2258_v38  ;;  %v529_v28 = vadd.f32 %v513_v50, %v378_v20  ;;  %v593_v26 = vmul.f32 %v2265_v45, %v571_v11  ;;  %v389_v34 = vadd.f32 %v1934_v1, %v2236_v9 }
  0xe0   : > { %v380_v30 = vpop.f32.mrf.mxu0  ;;  %v547_v43 = vmax.f32 %v531_v23, 0.0  ;;  %v613_v47 = vmul.f32 %v2308_v31, %v592_v24  ;;  %v410_v50 = vadd.f32 %v2236_v9, %v409_v49  ;;  %v611_v1 = vmul.f32 %v2308_v31, %v590_v37 }
  0xe1   : > { %v412_v36 = vpop.f32.mrf.mxu1  ;;  %v591_v39 = vmul.f32 %v2265_v45, %v569_v18  ;;  %v545_v8 = vmax.f32 %v529_v28, 0.0  ;;  %v532_v44 = vadd.f32 %v516_v55, %v389_v34  ;;  %v381_v46 = vadd.f32 %v2236_v9, %v380_v30 }
  0xe2   : > { %v413_v52 = vadd.f32 %v2236_v9, %v412_v36  ;;  %v614_v60 = vmul.f32 %v2308_v31, %v593_v26  ;;  %v577_v7 = vsub.f32 %v550_v41, %v2258_v38  ;;  %v574_v49 = vsub.f32 %v547_v43, %v2258_v38 }
  0xe3   : > { %v572_v48 = vsub.f32 %v545_v8, %v2258_v38  ;;  %v548_v55 = vmax.f32 %v532_v44, 0.0  ;;  %v530_v61 = vadd.f32 %v514_v51, %v381_v46  ;;  %v612_v4 = vmul.f32 %v2308_v31, %v591_v39 }
  0xe4   : > { %v538_v11 = vadd.f32 %v522_v15, %v413_v52  ;;  %v634_v19 = vadd.f32 %v2322_v56, %v613_v47  ;;  %v576_v20 = vsub.f32 %v549_v33, %v2258_v38  ;;  %v537_v51 = vadd.f32 %v521_v21, %v410_v50 }
  0xe5   : > { %v594_v13 = vmul.f32 %v2265_v45, %v572_v48  ;;  %v575_v17 = vsub.f32 %v548_v55, %v2258_v38  ;;  %v546_v18 = vmax.f32 %v530_v61, 0.0  ;;  %v635_v23 = vadd.f32 %v2322_v56, %v614_v60 }
  0xe6   : > { %v421_v28 = vadd.f32 %v1942_v14, %v2236_v9  ;;  %v599_v30 = vmul.f32 %v2265_v45, %v577_v7  ;;  %v554_v32 = vmax.f32 %v538_v11, 0.0  ;;  %v632_v26 = vadd.f32 %v2322_v56, %v611_v1 }
  0xe7   : > { %v597_v24 = vmul.f32 %v2265_v45, %v575_v17  ;;  %v573_v15 = vsub.f32 %v546_v18, %v2258_v38  ;;  %v633_v34 = vadd.f32 %v2322_v56, %v612_v4  ;;  %v596_v36 = vmul.f32 %v2265_v45, %v574_v49 }
  0xe8   : > { %v418_v21 = vadd.f32 %v2260_v40, %v2236_v9  ;;  %v615_v33 = vmul.f32 %v2308_v31, %v594_v13  ;;  %v598_v14 = vmul.f32 %v2265_v45, %v576_v20  ;;  %v579_v39 = vsub.f32 %v552_v22, %v2258_v38 }
  0xe9   : > { %v595_v37 = vmul.f32 %v2265_v45, %v573_v15  ;;  %v553_v41 = vmax.f32 %v537_v51, 0.0  ;;  %v655_v8 = vpack.c.bf16 %v633_v34, %v632_v26  ;;  %v656_v42 = vpack.c.bf16 %v635_v23, %v634_v19 }
  0xea   : > { %v618_v43 = vmul.f32 %v2308_v31, %v597_v24  ;;  %v540_v44 = vadd.f32 %v524_v27, %v421_v28  ;;  %v578_v47 = vsub.f32 %v551_v57, %v2258_v38  ;;  %v620_v9 = vmul.f32 %v2308_v31, %v599_v30 }
  0xeb   : > { %v616_v46 = vmul.f32 %v2308_v31, %v595_v37  ;;  %v581_v40 = vsub.f32 %v554_v32, %v2258_v38  ;;  %1947 = vmatprep.mubr.msk.bf16.mxu1 %vm668_vm2, %v655_v8  ;;  %v617_v48 = vmul.f32 %v2308_v31, %v596_v36  ;;  %v539_v50 = vadd.f32 %v2301_v25, %v418_v21 }
  0xec   : > { %1948 = vmatmul.mubr.msk.bf16.vlgmr.msra.gmra.mxu1 %vm668_vm2, %v656_v42  ;;  %v636_v52 = vadd.f32 %v2322_v56, %v615_v33  ;;  %v619_v60 = vmul.f32 %v2308_v31, %v598_v14  ;;  %v580_v57 = vsub.f32 %v553_v41, %v2258_v38  ;;  %v601_v55 = vmul.f32 %v2265_v45, %v579_v39  ;;  %v1786_v42 = vld [vmem:[%s2656_s3 + $0x58] sm:$0xff] }
  0xed   : > { %v637_v27 = vadd.f32 %v2322_v56, %v616_v46  ;;  %v556_v61 = vmax.f32 %v540_v44, 0.0  ;;  %v639_v4 = vadd.f32 %v2322_v56, %v618_v43  ;;  %v603_v7 = vmul.f32 %v2265_v45, %v581_v40  ;;  %v1800_v43 = vld [vmem:[%s2656_s3 + $0x88] sm:$0xff]  ;;  %v1798_v44 = vld [vmem:[%s2656_s3 + $0x78] sm:$0xff] }
  0xee   : > { %v641_v25 = vadd.f32 %v2322_v56, %v620_v9  ;;  %v600_v11 = vmul.f32 %v2265_v45, %v578_v47  ;;  %v555_v49 = vmax.f32 %v539_v50, 0.0  ;;  %v638_v13 = vadd.f32 %v2322_v56, %v617_v48  ;;  %v1799_v47 = vld [vmem:[%s2656_s3 + $0x80] sm:$0xff] }
  0xef   : > { %v657_v1 = vpack.c.bf16 %v637_v27, %v636_v52  ;;  %v602_v17 = vmul.f32 %v2265_v45, %v580_v57  ;;  %v640_v18 = vadd.f32 %v2322_v56, %v619_v60  ;;  %v622_v19 = vmul.f32 %v2308_v31, %v601_v55  ;;  %v1776_v50 = vld [vmem:[%s2657_s4 + $0x3] ss:$0 sm:$0xff] }
  0xf0   : > { %v583_v20 = vsub.f32 %v556_v61, %v2258_v38  ;;  %v658_v22 = vpack.c.bf16 %v639_v4, %v638_v13  ;;  %v624_v51 = vmul.f32 %v2308_v31, %v603_v7  ;;  %v621_v24 = vmul.f32 %v2308_v31, %v600_v11 }
  0xf1   : > { %1951 = vmatprep.mubr.msk.bf16.mxu1 %vm668_vm2, %v657_v1  ;;  %v659_v23 = vpack.c.bf16 %v641_v25, %v640_v18  ;;  %v582_v28 = vsub.f32 %v555_v49, %v2258_v38  ;;  %v623_v15 = vmul.f32 %v2308_v31, %v602_v17  ;;  %v643_v32 = vadd.f32 %v2322_v56, %v622_v19 }
  0xf2   : > { %v605_v30 = vmul.f32 %v2265_v45, %v583_v20  ;;  %v645_v26 = vadd.f32 %v2322_v56, %v624_v51  ;;  %v642_v36 = vadd.f32 %v2322_v56, %v621_v24  ;;  %v968_v9 = vpack.c.bf16 %v1799_v47, %v1798_v44 }
  0xf3   : > { %v604_v34 = vmul.f32 %v2265_v45, %v582_v28  ;;  %v644_v21 = vadd.f32 %v2322_v56, %v623_v15  ;;  %v1785_v45 = vld [vmem:[%s2656_s3 + $0x50] sm:$0xff] }
  0xf4   : > { %1952 = vmatmul.mubr.msk.bf16.gmra.mxu1 %vm668_vm2, %v658_v22  ;;  %v626_v38 = vmul.f32 %v2308_v31, %v605_v30  ;;  %v660_v33 = vpack.c.bf16 %v643_v32, %v642_v36 }
  0xf5   : > { %1955 = vmatprep.mubr.msk.bf16.mxu1 %vm668_vm2, %v659_v23  ;;  %v661_v37 = vpack.c.bf16 %v645_v26, %v644_v21  ;;  %v625_v14 = vmul.f32 %v2308_v31, %v604_v34  ;;  %v811_v31 = vpack.c.bf16 %v1786_v42, %v1785_v45 }
  0xf6   : > { %v647_v39 = vadd.f32 %v2322_v56, %v626_v38 }
  0xf7   : > { %v646_v41 = vadd.f32 %v2322_v56, %v625_v14  ;;  %1965 = vmatprep.subr.bf16.mxu0 %v811_v31  ;;  %v1801_v56 = vld [vmem:[%s2656_s3 + $0x90] sm:$0xff] }
  0xf8   : > { %1966 = vmatpush3.bf16.msra.mxu0 %v811_v31  ;;  %v969_v46 = vpack.c.bf16 %v1801_v56, %v1800_v43 }
  0xf9   : > { %v662_v8 = vpack.c.bf16 %v647_v39, %v646_v41 }
  0xfa   : > { %1983 = vmatprep.subr.bf16.mxu1 %v969_v46 }
  0xfb   : > { %1984 = vmatpush3.bf16.msra.mxu1 %v969_v46 }
  0xfc   : > { %1956 = vmatmul.mubr.msk.bf16.gmra.mxu1 %vm668_vm2, %v660_v33  ;;  %1985 = vmatprep.subr.bf16.mxu1 %v968_v9 }
  0xfd   : > { %1959 = vmatprep.mubr.msk.bf16.mxu1 %vm668_vm2, %v661_v37 }
  0xff   : > { %1986 = vmatpush3.bf16.msra.mxu1 %v968_v9 }
 0x104   : > { %1960 = vmatmul.mubr.msk.bf16.gmra.mxu1 %vm668_vm2, %v662_v8 }
 0x1ac   : > { %v1949_v40 = vpop.f32.mrf.mxu1 }
 0x1ad   : > { %v736_v57 = vadd.f32 %v1949_v40, %v1776_v50 }
 0x1ae   : > { %v727_v48 = vpop.f32.mrf.mxu1 }
 0x1af   : > { %v728_v27 = vadd.f32 %v1776_v50, %v727_v48  ;;  %v792_v11 = vmax.f32 %v736_v57, 0.0 }
 0x1b0   : > { %v1950_v52 = vpop.f32.mrf.mxu1 }
 0x1b1   : > { %v739_v60 = vadd.f32 %v1950_v52, %v1776_v50  ;;  %v790_v7 = vmax.f32 %v728_v27, 0.0 }
 0x1b2   : > { %v730_v55 = vpop.f32.mrf.mxu1 }
 0x1b3   : > { %v731_v61 = vadd.f32 %v1776_v50, %v730_v55  ;;  %v793_v1 = vmax.f32 %v739_v60, 0.0 }
 0x1b4   : > { %v1953_v4 = vpop.f32.mrf.mxu1 }
 0x1b5   : > { %v791_v25 = vmax.f32 %v731_v61, 0.0  ;;  %v814_v17 = vpack.c.bf16 %v793_v1, %v792_v11  ;;  %v752_v22 = vadd.f32 %v1953_v4, %v1776_v50  ;;  %v1815_v4 = vld [vmem:[%s2656_s3 + $0xb0] sm:$0xff] }
 0x1b6   : > { %v743_v49 = vpop.f32.mrf.mxu1 }
 0x1b7   : > { %v813_v13 = vpack.c.bf16 %v791_v25, %v790_v7  ;;  %v744_v19 = vadd.f32 %v1776_v50, %v743_v49  ;;  %v796_v32 = vmax.f32 %v752_v22, 0.0  ;;  %v1816_v7 = vld [vmem:[%s2656_s3 + $0xb8] sm:$0xff]  ;;  %v1789_v49 = vld [vmem:[%s2657_s4 + $0x4] ss:$0 sm:$0xff] }
 0x1b8   : > { %v1954_v18 = vpop.f32.mrf.mxu1  ;;  %v1179_v25 = vpack.c.bf16 %v1816_v7, %v1815_v4 }
 0x1b9   : > { %v755_v20 = vadd.f32 %v1954_v18, %v1776_v50  ;;  %1967 = vmatprep.mubr.msk.bf16.mxu0 %vm668_vm2, %v813_v13  ;;  %v794_v15 = vmax.f32 %v744_v19, 0.0 }
 0x1ba   : > { %v746_v51 = vpop.f32.mrf.mxu1  ;;  %1968 = vmatmul.mubr.msk.bf16.vlgmr.msra.gmra.mxu0 %vm668_vm2, %v814_v17  ;;  %2003 = vmatprep.subr.bf16.mxu0 %v1179_v25 }
 0x1bb   : > { %v747_v23 = vadd.f32 %v1776_v50, %v746_v51  ;;  %v797_v24 = vmax.f32 %v755_v20, 0.0  ;;  %2004 = vmatpush3.bf16.msra.mxu0 %v1179_v25 }
 0x1bc   : > { %v1957_v28 = vpop.f32.mrf.mxu1 }
 0x1bd   : > { %v795_v30 = vmax.f32 %v747_v23, 0.0  ;;  %v816_v36 = vpack.c.bf16 %v797_v24, %v796_v32  ;;  %v768_v37 = vadd.f32 %v1957_v28, %v1776_v50 }
 0x1be   : > { %v759_v26 = vpop.f32.mrf.mxu1 }
 0x1bf   : > { %v815_v34 = vpack.c.bf16 %v795_v30, %v794_v15  ;;  %v760_v38 = vadd.f32 %v1776_v50, %v759_v26  ;;  %v800_v31 = vmax.f32 %v768_v37, 0.0 }
 0x1c0   : > { %v1958_v21 = vpop.f32.mrf.mxu1 }
 0x1c1   : > { %v771_v33 = vadd.f32 %v1958_v21, %v1776_v50  ;;  %1971 = vmatprep.mubr.msk.bf16.mxu0 %vm668_vm2, %v815_v34  ;;  %v798_v45 = vmax.f32 %v760_v38, 0.0 }
 0x1c2   : > { %v762_v14 = vpop.f32.mrf.mxu1  ;;  %1972 = vmatmul.mubr.msk.bf16.gmra.mxu0 %vm668_vm2, %v816_v36 }
 0x1c3   : > { %v763_v39 = vadd.f32 %v1776_v50, %v762_v14  ;;  %v801_v41 = vmax.f32 %v771_v33, 0.0 }
 0x1c4   : > { %v1961_v8 = vpop.f32.mrf.mxu1 }
 0x1c5   : > { %v799_v42 = vmax.f32 %v763_v39, 0.0  ;;  %v818_v44 = vpack.c.bf16 %v801_v41, %v800_v31  ;;  %v784_v40 = vadd.f32 %v1961_v8, %v1776_v50 }
 0x1c6   : > { %v775_v43 = vpop.f32.mrf.mxu1 }
 0x1c7   : > { %v817_v56 = vpack.c.bf16 %v799_v42, %v798_v45  ;;  %v776_v47 = vadd.f32 %v1776_v50, %v775_v43  ;;  %v804_v55 = vmax.f32 %v784_v40, 0.0 }
 0x1c8   : > { %v1962_v46 = vpop.f32.mrf.mxu1 }
 0x1c9   : > { %v787_v9 = vadd.f32 %v1962_v46, %v1776_v50  ;;  %1975 = vmatprep.mubr.msk.bf16.mxu0 %vm668_vm2, %v817_v56  ;;  %v802_v60 = vmax.f32 %v776_v47, 0.0 }
 0x1ca   : > { %v778_v48 = vpop.f32.mrf.mxu1  ;;  %1976 = vmatmul.mubr.msk.bf16.gmra.mxu0 %vm668_vm2, %v818_v44 }
 0x1cb   : > { %v779_v52 = vadd.f32 %v1776_v50, %v778_v48  ;;  %v805_v27 = vmax.f32 %v787_v9, 0.0 }
 0x1cd   : > { %v803_v57 = vmax.f32 %v779_v52, 0.0  ;;  %v820_v1 = vpack.c.bf16 %v805_v27, %v804_v55 }
 0x1cf   : > { %v819_v61 = vpack.c.bf16 %v803_v57, %v802_v60 }
 0x1d1   : > { %1979 = vmatprep.mubr.msk.bf16.mxu0 %vm668_vm2, %v819_v61 }
 0x1d2   : > { %1980 = vmatmul.mubr.msk.bf16.gmra.mxu0 %vm668_vm2, %v820_v1 }
 0x27a   : > { %v1969_v50 = vpop.f32.mrf.mxu0 }
 0x27b   : > { %v893_v19 = vadd.f32 %v1969_v50, %v1789_v49 }
 0x27c   : > { %v884_v11 = vpop.f32.mrf.mxu0 }
 0x27d   : > { %v885_v17 = vadd.f32 %v1789_v49, %v884_v11  ;;  %v949_v15 = vmax.f32 %v893_v19, 0.0 }
 0x27e   : > { %v1970_v13 = vpop.f32.mrf.mxu0 }
 0x27f   : > { %v896_v18 = vadd.f32 %v1970_v13, %v1789_v49  ;;  %v947_v24 = vmax.f32 %v885_v17, 0.0 }
 0x280   : > { %v887_v20 = vpop.f32.mrf.mxu0 }
 0x281   : > { %v888_v22 = vadd.f32 %v1789_v49, %v887_v20  ;;  %v950_v51 = vmax.f32 %v896_v18, 0.0 }
 0x282   : > { %v1973_v23 = vpop.f32.mrf.mxu0 }
 0x283   : > { %v948_v28 = vmax.f32 %v888_v22, 0.0  ;;  %v971_v26 = vpack.c.bf16 %v950_v51, %v949_v15  ;;  %v909_v38 = vadd.f32 %v1973_v23, %v1789_v49  ;;  %v1813_v23 = vld [vmem:[%s2656_s3 + $0xa0] sm:$0xff] }
 0x284   : > { %v900_v30 = vpop.f32.mrf.mxu0  ;;  %v1829_v15 = vld [vmem:[%s2656_s3 + $0xe0] sm:$0xff] }
 0x285   : > { %v970_v32 = vpack.c.bf16 %v948_v28, %v947_v24  ;;  %v901_v36 = vadd.f32 %v1789_v49, %v900_v30  ;;  %v953_v45 = vmax.f32 %v909_v38, 0.0  ;;  %v1814_v24 = vld [vmem:[%s2656_s3 + $0xa8] sm:$0xff] }
 0x286   : > { %v1974_v34 = vpop.f32.mrf.mxu0  ;;  %v1178_v28 = vpack.c.bf16 %v1814_v24, %v1813_v23  ;;  %v1826_v30 = vld [vmem:[%s2656_s3 + $0xc8] sm:$0xff] }
 0x287   : > { %v912_v21 = vadd.f32 %v1974_v34, %v1789_v49  ;;  %1987 = vmatprep.mubr.msk.bf16.mxu1 %vm668_vm2, %v970_v32  ;;  %v951_v41 = vmax.f32 %v901_v36, 0.0  ;;  %v2457_v36 = vld [vmem:[%s2656_s3 + $0x98] ss:$0 sm:$0xff] }
 0x288   : > { %v903_v33 = vpop.f32.mrf.mxu0  ;;  %1988 = vmatmul.mubr.msk.bf16.vlgmr.msra.gmra.mxu1 %vm668_vm2, %v971_v26  ;;  %2005 = vmatprep.subr.bf16.mxu0 %v1178_v28  ;;  %v1827_v26 = vld [vmem:[%s2656_s3 + $0xd0] sm:$0xff]  ;;  %v1114_v23 = vmul.f32 %v2457_v36, %v2218_v0 }
 0x289   : > { %v904_v37 = vadd.f32 %v1789_v49, %v903_v33  ;;  %v954_v14 = vmax.f32 %v912_v21, 0.0  ;;  %2006 = vmatpush3.bf16.msra.mxu0 %v1178_v28  ;;  %v1335_v34 = vpack.c.bf16 %v1827_v26, %v1826_v30  ;;  %v2462_v21 = vld [vmem:[%s2657_s4 + $0x5] ss:$0 sm:$0xff]  ;;  %v1111_v33 = vmul.f32 %v2457_v36, %v2204_v54 }
 0x28a   : > { %v1977_v39 = vpop.f32.mrf.mxu0 }
 0x28b   : > { %v952_v8 = vmax.f32 %v904_v37, 0.0  ;;  %v973_v43 = vpack.c.bf16 %v954_v14, %v953_v45  ;;  %v925_v47 = vadd.f32 %v1977_v39, %v1789_v49  ;;  %v1109_v39 = vmul.f32 %v2457_v36, %v2202_v53 }
 0x28c   : > { %v916_v42 = vpop.f32.mrf.mxu0 }
 0x28d   : > { %v972_v31 = vpack.c.bf16 %v952_v8, %v951_v41  ;;  %v917_v44 = vadd.f32 %v1789_v49, %v916_v42  ;;  %v957_v57 = vmax.f32 %v925_v47, 0.0  ;;  %v1112_v42 = vmul.f32 %v2457_v36, %v2214_v59 }
 0x28e   : > { %v1978_v56 = vpop.f32.mrf.mxu0 }
 0x28f   : > { %v928_v46 = vadd.f32 %v1978_v56, %v1789_v49  ;;  %1991 = vmatprep.mubr.msk.bf16.mxu1 %vm668_vm2, %v972_v31  ;;  %v955_v27 = vmax.f32 %v917_v44, 0.0  ;;  %v1110_v44 = vmul.f32 %v2457_v36, %v2212_v58 }
 0x290   : > { %v919_v9 = vpop.f32.mrf.mxu0  ;;  %1992 = vmatmul.mubr.msk.bf16.gmra.mxu1 %vm668_vm2, %v973_v43 }
 0x291   : > { %v920_v40 = vadd.f32 %v1789_v49, %v919_v9  ;;  %v958_v48 = vmax.f32 %v928_v46, 0.0 }
 0x292   : > { %v1981_v52 = vpop.f32.mrf.mxu0 }
 0x293   : > { %v956_v60 = vmax.f32 %v920_v40, 0.0  ;;  %v975_v1 = vpack.c.bf16 %v958_v48, %v957_v57  ;;  %v941_v50 = vadd.f32 %v1981_v52, %v1789_v49  ;;  %v1113_v57 = vmul.f32 %v2457_v36, %v2216_v62 }
 0x294   : > { %v932_v55 = vpop.f32.mrf.mxu0 }
 0x295   : > { %v974_v61 = vpack.c.bf16 %v956_v60, %v955_v27  ;;  %v933_v7 = vadd.f32 %v1789_v49, %v932_v55  ;;  %v961_v20 = vmax.f32 %v941_v50, 0.0  ;;  %v1115_v55 = vmul.f32 %v2457_v36, %v2220_v2 }
 0x296   : > { %v1982_v4 = vpop.f32.mrf.mxu0 }
 0x297   : > { %v944_v25 = vadd.f32 %v1982_v4, %v1789_v49  ;;  %1995 = vmatprep.mubr.msk.bf16.mxu1 %vm668_vm2, %v974_v61  ;;  %v959_v18 = vmax.f32 %v933_v7, 0.0 }
 0x298   : > { %v935_v11 = vpop.f32.mrf.mxu0  ;;  %1996 = vmatmul.mubr.msk.bf16.gmra.mxu1 %vm668_vm2, %v975_v1 }
 0x299   : > { %v936_v13 = vadd.f32 %v1789_v49, %v935_v11  ;;  %v962_v17 = vmax.f32 %v944_v25, 0.0  ;;  %v1828_v49 = vld [vmem:[%s2656_s3 + $0xd8] sm:$0xff] }
 0x29a   : > { %v1336_v32 = vpack.c.bf16 %v1829_v15, %v1828_v49 }
 0x29b   : > { %v960_v19 = vmax.f32 %v936_v13, 0.0  ;;  %v977_v51 = vpack.c.bf16 %v962_v17, %v961_v20  ;;  %v1116_v20 = vmul.f32 %v2457_v36, %v2222_v3 }
 0x29c   : > { %2023 = vmatprep.subr.bf16.mxu1 %v1336_v32 }
 0x29d   : > { %v976_v22 = vpack.c.bf16 %v960_v19, %v959_v18  ;;  %2024 = vmatpush3.bf16.msra.mxu1 %v1336_v32  ;;  %v1119_v32 = vmul.f32 %v2457_v36, %v2240_v12 }
 0x29e   : > { %2025 = vmatprep.subr.bf16.mxu1 %v1335_v34 }
 0x29f   : > { %1999 = vmatprep.mubr.msk.bf16.mxu1 %vm668_vm2, %v976_v22 }
 0x2a0   : > { %2000 = vmatmul.mubr.msk.bf16.gmra.mxu1 %vm668_vm2, %v977_v51 }
 0x2a1   : > { %2026 = vmatpush3.bf16.msra.mxu1 %v1335_v34 }
 0x348   : > { %v1989_v38 = vpop.f32.mrf.mxu1 }
 0x349   : > { %v1050_v37 = vadd.f32 %v1989_v38, %v2462_v21 }
 0x34a   : > { %v1041_v14 = vpop.f32.mrf.mxu1 }
 0x34b   : > { %v1127_v41 = vadd.f32 %v1111_v33, %v1050_v37  ;;  %v1042_v8 = vadd.f32 %v2462_v21, %v1041_v14 }
 0x34c   : > { %v1990_v45 = vpop.f32.mrf.mxu1 }
 0x34d   : > { %v1125_v31 = vadd.f32 %v1109_v39, %v1042_v8  ;;  %v1053_v43 = vadd.f32 %v1990_v45, %v2462_v21  ;;  %v1143_v46 = vmax.f32 %v1127_v41, 0.0  ;;  %v1117_v8 = vmul.f32 %v2457_v36, %v2224_v5 }
 0x34e   : > { %v1044_v56 = vpop.f32.mrf.mxu1 }
 0x34f   : > { %v1128_v47 = vadd.f32 %v1112_v42, %v1053_v43  ;;  %v1045_v9 = vadd.f32 %v2462_v21, %v1044_v56  ;;  %v1141_v48 = vmax.f32 %v1125_v31, 0.0  ;;  %v1159_v1 = vmul.f32 %v1143_v46, %v1127_v41 }
 0x350   : > { %v1993_v40 = vpop.f32.mrf.mxu1  ;;  %v1120_v43 = vmul.f32 %v2457_v36, %v2243_v16 }
 0x351   : > { %v1144_v52 = vmax.f32 %v1128_v47, 0.0  ;;  %v1126_v27 = vadd.f32 %v1110_v44, %v1045_v9  ;;  %v1066_v60 = vadd.f32 %v1993_v40, %v2462_v21  ;;  %v1157_v13 = vmul.f32 %v1141_v48, %v1125_v31 }
 0x352   : > { %v1057_v61 = vpop.f32.mrf.mxu1 }
 0x353   : > { %v1160_v4 = vmul.f32 %v1144_v52, %v1128_v47  ;;  %v1142_v7 = vmax.f32 %v1126_v27, 0.0  ;;  %v1058_v25 = vadd.f32 %v2462_v21, %v1057_v61  ;;  %v1131_v50 = vadd.f32 %v1115_v55, %v1066_v60 }
 0x354   : > { %v1994_v11 = vpop.f32.mrf.mxu1  ;;  %v1118_v60 = vmul.f32 %v2457_v36, %v2226_v6  ;;  %v1123_v61 = vmul.f32 %v2457_v36, %v2283_v63 }
 0x355   : > { %v1181_v17 = vpack.c.bf16 %v1160_v4, %v1159_v1  ;;  %v1158_v18 = vmul.f32 %v1142_v7, %v1126_v27  ;;  %v1129_v19 = vadd.f32 %v1113_v57, %v1058_v25  ;;  %v1069_v22 = vadd.f32 %v1994_v11, %v2462_v21 }
 0x356   : > { %v1060_v51 = vpop.f32.mrf.mxu1  ;;  %v1147_v49 = vmax.f32 %v1131_v50, 0.0  ;;  %v1121_v7 = vmul.f32 %v2457_v36, %v2253_v29 }
 0x357   : > { %v1180_v24 = vpack.c.bf16 %v1158_v18, %v1157_v13  ;;  %v1061_v28 = vadd.f32 %v2462_v21, %v1060_v51  ;;  %v1132_v15 = vadd.f32 %v1116_v20, %v1069_v22  ;;  %v1145_v26 = vmax.f32 %v1129_v19, 0.0 }
 0x358   : > { %v1997_v30 = vpop.f32.mrf.mxu1  ;;  %v1163_v45 = vmul.f32 %v1147_v49, %v1131_v50  ;;  %v1124_v51 = vmul.f32 %v2457_v36, %v2286_v10 }
 0x359   : > { %v1130_v34 = vadd.f32 %v1114_v23, %v1061_v28  ;;  %v1082_v38 = vadd.f32 %v1997_v30, %v2462_v21  ;;  %2007 = vmatprep.mubr.msk.bf16.mxu0 %vm668_vm2, %v1180_v24  ;;  %v1148_v33 = vmax.f32 %v1132_v15, 0.0  ;;  %v1161_v56 = vmul.f32 %v1145_v26, %v1129_v19 }
 0x35a   : > { %v1073_v37 = vpop.f32.mrf.mxu1  ;;  %2008 = vmatmul.mubr.msk.bf16.vlgmr.msra.gmra.mxu0 %vm668_vm2, %v1181_v17 }
 0x35b   : > { %v1146_v14 = vmax.f32 %v1130_v34, 0.0  ;;  %v1135_v39 = vadd.f32 %v1119_v32, %v1082_v38  ;;  %v1074_v41 = vadd.f32 %v2462_v21, %v1073_v37  ;;  %v1164_v42 = vmul.f32 %v1148_v33, %v1132_v15 }
 0x35c   : > { %v1998_v31 = vpop.f32.mrf.mxu1  ;;  %v1122_v32 = vmul.f32 %v2457_v36, %v2256_v35  ;;  %v1841_v36 = vld [vmem:[%s2656_s3 + $0x100] sm:$0xff] }
 0x35d   : > { %v1162_v44 = vmul.f32 %v1146_v14, %v1130_v34  ;;  %v1085_v46 = vadd.f32 %v1998_v31, %v2462_v21  ;;  %v1183_v47 = vpack.c.bf16 %v1164_v42, %v1163_v45  ;;  %v1133_v9 = vadd.f32 %v1117_v8, %v1074_v41 }
 0x35e   : > { %v1076_v40 = vpop.f32.mrf.mxu1  ;;  %v1151_v52 = vmax.f32 %v1135_v39, 0.0 }
 0x35f   : > { %v1182_v48 = vpack.c.bf16 %v1162_v44, %v1161_v56  ;;  %v1136_v27 = vadd.f32 %v1120_v43, %v1085_v46  ;;  %v1077_v57 = vadd.f32 %v2462_v21, %v1076_v40  ;;  %v1149_v25 = vmax.f32 %v1133_v9, 0.0  ;;  %v1839_v44 = vld [vmem:[%s2656_s3 + $0xf0] sm:$0xff] }
 0x360   : > { %v2001_v55 = vpop.f32.mrf.mxu1  ;;  %v1167_v13 = vmul.f32 %v1151_v52, %v1135_v39  ;;  %v1817_v52 = vld [vmem:[%s2657_s4 + $0x6] ss:$0 sm:$0xff] }
 0x361   : > { %v1152_v1 = vmax.f32 %v1136_v27, 0.0  ;;  %v1098_v4 = vadd.f32 %v2001_v55, %v2462_v21  ;;  %2011 = vmatprep.mubr.msk.bf16.mxu0 %vm668_vm2, %v1182_v48  ;;  %v1134_v50 = vadd.f32 %v1118_v60, %v1077_v57  ;;  %v1165_v49 = vmul.f32 %v1149_v25, %v1133_v9 }
 0x362   : > { %v1089_v11 = vpop.f32.mrf.mxu1  ;;  %2012 = vmatmul.mubr.msk.bf16.gmra.mxu0 %vm668_vm2, %v1183_v47  ;;  %v1840_v47 = vld [vmem:[%s2656_s3 + $0xf8] sm:$0xff] }
 0x363   : > { %v1168_v17 = vmul.f32 %v1152_v1, %v1136_v27  ;;  %v1139_v18 = vadd.f32 %v1123_v61, %v1098_v4  ;;  %v1090_v19 = vadd.f32 %v2462_v21, %v1089_v11  ;;  %v1150_v20 = vmax.f32 %v1134_v50, 0.0 }
 0x364   : > { %v2002_v22 = vpop.f32.mrf.mxu1  ;;  %v1492_v9 = vpack.c.bf16 %v1840_v47, %v1839_v44 }
 0x365   : > { %v1185_v23 = vpack.c.bf16 %v1168_v17, %v1167_v13  ;;  %v1137_v24 = vadd.f32 %v1121_v7, %v1090_v19  ;;  %v1101_v28 = vadd.f32 %v2002_v22, %v2462_v21  ;;  %v1166_v15 = vmul.f32 %v1150_v20, %v1134_v50 }
 0x366   : > { %v1092_v30 = vpop.f32.mrf.mxu1  ;;  %v1155_v26 = vmax.f32 %v1139_v18, 0.0 }
 0x367   : > { %v1140_v34 = vadd.f32 %v1124_v51, %v1101_v28  ;;  %v1093_v38 = vadd.f32 %v2462_v21, %v1092_v30  ;;  %v1184_v33 = vpack.c.bf16 %v1166_v15, %v1165_v49  ;;  %v1153_v37 = vmax.f32 %v1137_v24, 0.0  ;;  %v1842_v21 = vld [vmem:[%s2656_s3 + $0x108] sm:$0xff] }
 0x368   : > { %v1171_v41 = vmul.f32 %v1155_v26, %v1139_v18  ;;  %v1493_v46 = vpack.c.bf16 %v1842_v21, %v1841_v36 }
 0x369   : > { %v1156_v14 = vmax.f32 %v1140_v34, 0.0  ;;  %v1138_v39 = vadd.f32 %v1122_v32, %v1093_v38  ;;  %2015 = vmatprep.mubr.msk.bf16.mxu0 %vm668_vm2, %v1184_v33  ;;  %v1169_v42 = vmul.f32 %v1153_v37, %v1137_v24 }
 0x36a   : > { %2016 = vmatmul.mubr.msk.bf16.gmra.mxu0 %vm668_vm2, %v1185_v23  ;;  %2043 = vmatprep.subr.bf16.mxu0 %v1493_v46 }
 0x36b   : > { %v1172_v8 = vmul.f32 %v1156_v14, %v1140_v34  ;;  %v1154_v45 = vmax.f32 %v1138_v39, 0.0  ;;  %2044 = vmatpush3.bf16.msra.mxu0 %v1493_v46 }
 0x36c   : > { %2045 = vmatprep.subr.bf16.mxu0 %v1492_v9 }
 0x36d   : > { %v1187_v31 = vpack.c.bf16 %v1172_v8, %v1171_v41  ;;  %v1170_v43 = vmul.f32 %v1154_v45, %v1138_v39 }
 0x36f   : > { %v1186_v56 = vpack.c.bf16 %v1170_v43, %v1169_v42  ;;  %2046 = vmatpush3.bf16.msra.mxu0 %v1492_v9 }
 0x371   : > { %2019 = vmatprep.mubr.msk.bf16.mxu0 %vm668_vm2, %v1186_v56 }
 0x372   : > { %2020 = vmatmul.mubr.msk.bf16.gmra.mxu0 %vm668_vm2, %v1187_v31 }
 0x41a   : > { %v2009_v40 = vpop.f32.mrf.mxu0 }
 0x41b   : > { %v1260_v55 = vadd.f32 %v2009_v40, %v1817_v52 }
 0x41c   : > { %v1251_v48 = vpop.f32.mrf.mxu0 }
 0x41d   : > { %v1252_v60 = vadd.f32 %v1817_v52, %v1251_v48  ;;  %v1316_v11 = vmax.f32 %v1260_v55, 0.0 }
 0x41e   : > { %v2010_v27 = vpop.f32.mrf.mxu0 }
 0x41f   : > { %v1263_v57 = vadd.f32 %v2010_v27, %v1817_v52  ;;  %v1314_v25 = vmax.f32 %v1252_v60, 0.0 }
 0x420   : > { %v1254_v61 = vpop.f32.mrf.mxu0 }
 0x421   : > { %v1255_v1 = vadd.f32 %v1817_v52, %v1254_v61  ;;  %v1317_v4 = vmax.f32 %v1263_v57, 0.0 }
 0x422   : > { %v2013_v7 = vpop.f32.mrf.mxu0 }
 0x423   : > { %v1315_v50 = vmax.f32 %v1255_v1, 0.0  ;;  %v1338_v18 = vpack.c.bf16 %v1317_v4, %v1316_v11  ;;  %v1276_v51 = vadd.f32 %v2013_v7, %v1817_v52 }
 0x424   : > { %v1267_v13 = vpop.f32.mrf.mxu0 }
 0x425   : > { %v1337_v17 = vpack.c.bf16 %v1315_v50, %v1314_v25  ;;  %v1268_v20 = vadd.f32 %v1817_v52, %v1267_v13  ;;  %v1320_v32 = vmax.f32 %v1276_v51, 0.0  ;;  %v1830_v50 = vld [vmem:[%s2657_s4 + $0x7] ss:$0 sm:$0xff] }
 0x426   : > { %v2014_v19 = vpop.f32.mrf.mxu0 }
 0x427   : > { %v1279_v22 = vadd.f32 %v2014_v19, %v1817_v52  ;;  %2027 = vmatprep.mubr.msk.bf16.mxu1 %vm668_vm2, %v1337_v17  ;;  %v1318_v49 = vmax.f32 %v1268_v20, 0.0 }
 0x428   : > { %v1270_v23 = vpop.f32.mrf.mxu0  ;;  %2028 = vmatmul.mubr.msk.bf16.vlgmr.msra.gmra.mxu1 %vm668_vm2, %v1338_v18 }
 0x429   : > { %v1271_v24 = vadd.f32 %v1817_v52, %v1270_v23  ;;  %v1321_v28 = vmax.f32 %v1279_v22, 0.0 }
 0x42a   : > { %v2017_v30 = vpop.f32.mrf.mxu0 }
 0x42b   : > { %v1319_v15 = vmax.f32 %v1271_v24, 0.0  ;;  %v1340_v38 = vpack.c.bf16 %v1321_v28, %v1320_v32  ;;  %v1292_v39 = vadd.f32 %v2017_v30, %v1817_v52 }
 0x42c   : > { %v1283_v34 = vpop.f32.mrf.mxu0 }
 0x42d   : > { %v1339_v26 = vpack.c.bf16 %v1319_v15, %v1318_v49  ;;  %v1284_v37 = vadd.f32 %v1817_v52, %v1283_v34  ;;  %v1324_v56 = vmax.f32 %v1292_v39, 0.0 }
 0x42e   : > { %v2018_v33 = vpop.f32.mrf.mxu0 }
 0x42f   : > { %2031 = vmatprep.mubr.msk.bf16.mxu1 %vm668_vm2, %v1339_v26  ;;  %v1295_v14 = vadd.f32 %v2018_v33, %v1817_v52  ;;  %v1322_v31 = vmax.f32 %v1284_v37, 0.0 }
 0x430   : > { %2032 = vmatmul.mubr.msk.bf16.gmra.mxu1 %vm668_vm2, %v1340_v38  ;;  %v1286_v41 = vpop.f32.mrf.mxu0 }
 0x431   : > { %v1287_v8 = vadd.f32 %v1817_v52, %v1286_v41  ;;  %v1325_v45 = vmax.f32 %v1295_v14, 0.0 }
 0x432   : > { %v2021_v42 = vpop.f32.mrf.mxu0 }
 0x433   : > { %v1323_v43 = vmax.f32 %v1287_v8, 0.0  ;;  %v1342_v44 = vpack.c.bf16 %v1325_v45, %v1324_v56  ;;  %v1308_v40 = vadd.f32 %v2021_v42, %v1817_v52 }
 0x434   : > { %v1299_v36 = vpop.f32.mrf.mxu0 }
 0x435   : > { %v1341_v21 = vpack.c.bf16 %v1323_v43, %v1322_v31  ;;  %v1300_v47 = vadd.f32 %v1817_v52, %v1299_v36  ;;  %v1328_v61 = vmax.f32 %v1308_v40, 0.0 }
 0x436   : > { %v2022_v46 = vpop.f32.mrf.mxu0 }
 0x437   : > { %v1311_v9 = vadd.f32 %v2022_v46, %v1817_v52  ;;  %2035 = vmatprep.mubr.msk.bf16.mxu1 %vm668_vm2, %v1341_v21  ;;  %v1326_v57 = vmax.f32 %v1300_v47, 0.0 }
 0x438   : > { %v1302_v48 = vpop.f32.mrf.mxu0  ;;  %2036 = vmatmul.mubr.msk.bf16.gmra.mxu1 %vm668_vm2, %v1342_v44 }
 0x439   : > { %v1303_v27 = vadd.f32 %v1817_v52, %v1302_v48  ;;  %v1329_v60 = vmax.f32 %v1311_v9, 0.0 }
 0x43b   : > { %v1327_v55 = vmax.f32 %v1303_v27, 0.0  ;;  %v1344_v4 = vpack.c.bf16 %v1329_v60, %v1328_v61 }
 0x43d   : > { %v1343_v1 = vpack.c.bf16 %v1327_v55, %v1326_v57 }
 0x43f   : > { %2039 = vmatprep.mubr.msk.bf16.mxu1 %vm668_vm2, %v1343_v1 }
 0x440   : > { %2040 = vmatmul.mubr.msk.bf16.gmra.mxu1 %vm668_vm2, %v1344_v4 }
 0x4e8   : > { %v2029_v7 = vpop.f32.mrf.mxu1 }
 0x4e9   : > { %v1417_v52 = vadd.f32 %v2029_v7, %v1830_v50 }
 0x4ea   : > { %v1408_v25 = vpop.f32.mrf.mxu1 }
 0x4eb   : > { %v1409_v13 = vadd.f32 %v1830_v50, %v1408_v25  ;;  %v1473_v24 = vmax.f32 %v1417_v52, 0.0 }
 0x4ec   : > { %v2030_v11 = vpop.f32.mrf.mxu1 }
 0x4ed   : > { %v1420_v17 = vadd.f32 %v2030_v11, %v1830_v50  ;;  %v1471_v51 = vmax.f32 %v1409_v13, 0.0 }
 0x4ee   : > { %v1411_v18 = vpop.f32.mrf.mxu1 }
 0x4ef   : > { %v1412_v19 = vadd.f32 %v1830_v50, %v1411_v18  ;;  %v1474_v20 = vmax.f32 %v1420_v17, 0.0 }
 0x4f0   : > { %v2033_v22 = vpop.f32.mrf.mxu1 }
 0x4f1   : > { %v1472_v23 = vmax.f32 %v1412_v19, 0.0  ;;  %v1495_v15 = vpack.c.bf16 %v1474_v20, %v1473_v24  ;;  %v1433_v34 = vadd.f32 %v2033_v22, %v1830_v50  ;;  %v2557_v22 = vld [vmem:[%s2656_s3 + $0x110] ss:$0 sm:$0xff] }
 0x4f2   : > { %v1424_v28 = vpop.f32.mrf.mxu1 }
 0x4f3   : > { %v1494_v49 = vpack.c.bf16 %v1472_v23, %v1471_v51  ;;  %v1425_v32 = vadd.f32 %v1830_v50, %v1424_v28  ;;  %v1477_v8 = vmax.f32 %v1433_v34, 0.0  ;;  %v2562_v51 = vld [vmem:[%s2657_s4 + $0x8] ss:$0 sm:$0xff]  ;;  %v1635_v23 = vmul.f32 %v2557_v22, %v2204_v54 }
 0x4f4   : > { %v2034_v30 = vpop.f32.mrf.mxu1  ;;  %v1636_v54 = vmul.f32 %v2557_v22, %v2214_v59  ;;  %v1639_v59 = vmul.f32 %v2557_v22, %v2220_v2  ;;  %v1640_v2 = vmul.f32 %v2557_v22, %v2222_v3 }
 0x4f5   : > { %v1436_v26 = vadd.f32 %v2034_v30, %v1830_v50  ;;  %2047 = vmatprep.mubr.msk.bf16.mxu0 %vm668_vm2, %v1494_v49  ;;  %v1475_v14 = vmax.f32 %v1425_v32, 0.0  ;;  %v1633_v49 = vmul.f32 %v2557_v22, %v2202_v53 }
 0x4f6   : > { %v1427_v38 = vpop.f32.mrf.mxu1  ;;  %2048 = vmatmul.mubr.msk.bf16.vlgmr.msra.gmra.mxu0 %vm668_vm2, %v1495_v15 }
 0x4f7   : > { %v1428_v33 = vadd.f32 %v1830_v50, %v1427_v38  ;;  %v1478_v37 = vmax.f32 %v1436_v26, 0.0 }
 0x4f8   : > { %v2037_v41 = vpop.f32.mrf.mxu1 }
 0x4f9   : > { %v1476_v39 = vmax.f32 %v1428_v33, 0.0  ;;  %v1497_v31 = vpack.c.bf16 %v1478_v37, %v1477_v8  ;;  %v1449_v21 = vadd.f32 %v2037_v41, %v1830_v50  ;;  %v1634_v33 = vmul.f32 %v2557_v22, %v2212_v58 }
 0x4fa   : > { %v1440_v42 = vpop.f32.mrf.mxu1  ;;  %v1637_v58 = vmul.f32 %v2557_v22, %v2216_v62 }
 0x4fb   : > { %v1496_v45 = vpack.c.bf16 %v1476_v39, %v1475_v14  ;;  %v1441_v56 = vadd.f32 %v1830_v50, %v1440_v42  ;;  %v1481_v27 = vmax.f32 %v1449_v21, 0.0  ;;  %v1638_v21 = vmul.f32 %v2557_v22, %v2218_v0 }
 0x4fc   : > { %v2038_v43 = vpop.f32.mrf.mxu1  ;;  %v1641_v0 = vmul.f32 %v2557_v22, %v2224_v5 }
 0x4fd   : > { %2051 = vmatprep.mubr.msk.bf16.mxu0 %vm668_vm2, %v1496_v45  ;;  %v1452_v36 = vadd.f32 %v2038_v43, %v1830_v50  ;;  %v1479_v40 = vmax.f32 %v1441_v56, 0.0 }
 0x4fe   : > { %2052 = vmatmul.mubr.msk.bf16.gmra.mxu0 %vm668_vm2, %v1497_v31  ;;  %v1443_v44 = vpop.f32.mrf.mxu1 }
 0x4ff   : > { %v1444_v46 = vadd.f32 %v1830_v50, %v1443_v44  ;;  %v1482_v47 = vmax.f32 %v1452_v36, 0.0 }
 0x500   : > { %v2041_v9 = vpop.f32.mrf.mxu1 }
 0x501   : > { %v1480_v48 = vmax.f32 %v1444_v46, 0.0  ;;  %v1499_v55 = vpack.c.bf16 %v1482_v47, %v1481_v27  ;;  %v1465_v7 = vadd.f32 %v2041_v9, %v1830_v50  ;;  %v1643_v47 = vmul.f32 %v2557_v22, %v2240_v12 }
 0x502   : > { %v1456_v60 = vpop.f32.mrf.mxu1 }
 0x503   : > { %v1498_v57 = vpack.c.bf16 %v1480_v48, %v1479_v40  ;;  %v1457_v1 = vadd.f32 %v1830_v50, %v1456_v60  ;;  %v1485_v18 = vmax.f32 %v1465_v7, 0.0 }
 0x504   : > { %v2042_v61 = vpop.f32.mrf.mxu1 }
 0x505   : > { %v1468_v4 = vadd.f32 %v2042_v61, %v1830_v50  ;;  %2055 = vmatprep.mubr.msk.bf16.mxu0 %vm668_vm2, %v1498_v57  ;;  %v1483_v17 = vmax.f32 %v1457_v1, 0.0  ;;  %v1644_v57 = vmul.f32 %v2557_v22, %v2243_v16  ;;  %v1642_v1 = vmul.f32 %v2557_v22, %v2226_v6 }
 0x506   : > { %v1459_v25 = vpop.f32.mrf.mxu1  ;;  %2056 = vmatmul.mubr.msk.bf16.gmra.mxu0 %vm668_vm2, %v1499_v55  ;;  %v1647_v16 = vmul.f32 %v2557_v22, %v2283_v63  ;;  %v1645_v6 = vmul.f32 %v2557_v22, %v2253_v29  ;;  %v1648_v63 = vmul.f32 %v2557_v22, %v2286_v10 }
 0x507   : > { %v1460_v11 = vadd.f32 %v1830_v50, %v1459_v25  ;;  %v1486_v13 = vmax.f32 %v1468_v4, 0.0 }
 0x509   : > { %v1484_v52 = vmax.f32 %v1460_v11, 0.0  ;;  %v1501_v20 = vpack.c.bf16 %v1486_v13, %v1485_v18 }
 0x50b   : > { %v1500_v19 = vpack.c.bf16 %v1484_v52, %v1483_v17 }
 0x50d   : > { %2059 = vmatprep.mubr.msk.bf16.mxu0 %vm668_vm2, %v1500_v19 }
 0x50e   : > { %2060 = vmatmul.mubr.msk.bf16.gmra.mxu0 %vm668_vm2, %v1501_v20 }
 0x5b6   : > { %v2049_v50 = vpop.f32.mrf.mxu0 }
 0x5b7   : > { %v1574_v24 = vadd.f32 %v2049_v50, %v2562_v51 }
 0x5b8   : > { %v1565_v28 = vpop.f32.mrf.mxu0 }
 0x5b9   : > { %v1651_v15 = vadd.f32 %v1635_v23, %v1574_v24  ;;  %v1566_v30 = vadd.f32 %v2562_v51, %v1565_v28  ;;  %v1646_v23 = vmul.f32 %v2557_v22, %v2256_v35 }
 0x5ba   : > { %v2050_v32 = vpop.f32.mrf.mxu0 }
 0x5bb   : > { %1667 = vst.msk [vmem:[%s2571_s14 + $0x10] sm:$0xff] %vm298_vm1, %v1651_v15  ;;  %v1649_v26 = vadd.f32 %v1633_v49, %v1566_v30  ;;  %v1577_v34 = vadd.f32 %v2050_v32, %v2562_v51 }
 0x5bc   : > { %v1568_v38 = vpop.f32.mrf.mxu0 }
 0x5bd   : > { %1665 = vst.msk [vmem:[%s2571_s14] sm:$0xff] %vm298_vm1, %v1649_v26  ;;  %v1652_v53 = vadd.f32 %v1636_v54, %v1577_v34  ;;  %v1569_v37 = vadd.f32 %v2562_v51, %v1568_v38 }
 0x5be   : > { %v2053_v14 = vpop.f32.mrf.mxu0 }
 0x5bf   : > { %1668 = vst.msk [vmem:[%s2571_s14 + $0x18] sm:$0xff] %vm298_vm1, %v1652_v53  ;;  %v1650_v39 = vadd.f32 %v1634_v33, %v1569_v37  ;;  %v1590_v41 = vadd.f32 %v2053_v14, %v2562_v51 }
 0x5c0   : > { %v1581_v8 = vpop.f32.mrf.mxu0 }
 0x5c1   : > { %1666 = vst.msk [vmem:[%s2571_s14 + $0x8] sm:$0xff] %vm298_vm1, %v1650_v39  ;;  %v1655_v45 = vadd.f32 %v1639_v59, %v1590_v41  ;;  %v1582_v42 = vadd.f32 %v2562_v51, %v1581_v8 }
 0x5c2   : > { %v2054_v31 = vpop.f32.mrf.mxu0 }
 0x5c3   : > { %1671 = vst.msk [vmem:[%s2571_s14 + $0x30] sm:$0xff] %vm298_vm1, %v1655_v45  ;;  %v1653_v43 = vadd.f32 %v1637_v58, %v1582_v42  ;;  %v1593_v56 = vadd.f32 %v2054_v31, %v2562_v51 }
 0x5c4   : > { %v1584_v36 = vpop.f32.mrf.mxu0 }
 0x5c5   : > { %1669 = vst.msk [vmem:[%s2571_s14 + $0x20] sm:$0xff] %vm298_vm1, %v1653_v43  ;;  %v1656_v62 = vadd.f32 %v1640_v2, %v1593_v56  ;;  %v1585_v44 = vadd.f32 %v2562_v51, %v1584_v36 }
 0x5c6   : > { %v2057_v3 = vpop.f32.mrf.mxu0 }
 0x5c7   : > { %1672 = vst.msk [vmem:[%s2571_s14 + $0x38] sm:$0xff] %vm298_vm1, %v1656_v62  ;;  %v1654_v46 = vadd.f32 %v1638_v21, %v1585_v44  ;;  %v1606_v9 = vadd.f32 %v2057_v3, %v2562_v51 }
 0x5c8   : > { %v1597_v40 = vpop.f32.mrf.mxu0 }
 0x5c9   : > { %1670 = vst.msk [vmem:[%s2571_s14 + $0x28] sm:$0xff] %vm298_vm1, %v1654_v46  ;;  %v1659_v48 = vadd.f32 %v1643_v47, %v1606_v9  ;;  %v1598_v27 = vadd.f32 %v2562_v51, %v1597_v40 }
 0x5ca   : > { %v2058_v60 = vpop.f32.mrf.mxu0 }
 0x5cb   : > { %1675 = vst.msk [vmem:[%s2571_s14 + $0x50] sm:$0xff] %vm298_vm1, %v1659_v48  ;;  %v1657_v12 = vadd.f32 %v1641_v0, %v1598_v27  ;;  %v1609_v55 = vadd.f32 %v2058_v60, %v2562_v51 }
 0x5cc   : > { %v1600_v61 = vpop.f32.mrf.mxu0 }
 0x5cd   : > { %1673 = vst.msk [vmem:[%s2571_s14 + $0x40] sm:$0xff] %vm298_vm1, %v1657_v12  ;;  %v1660_v5 = vadd.f32 %v1644_v57, %v1609_v55  ;;  %v1601_v4 = vadd.f32 %v2562_v51, %v1600_v61 }
 0x5ce   : > { %v2061_v7 = vpop.f32.mrf.mxu0 }
 0x5cf   : > { %1676 = vst.msk [vmem:[%s2571_s14 + $0x58] sm:$0xff] %vm298_vm1, %v1660_v5  ;;  %v1658_v25 = vadd.f32 %v1642_v1, %v1601_v4  ;;  %v1622_v11 = vadd.f32 %v2061_v7, %v2562_v51 }
 0x5d0   : > { %v1613_v13 = vpop.f32.mrf.mxu0 }
 0x5d1   : > { %1674 = vst.msk [vmem:[%s2571_s14 + $0x48] sm:$0xff] %vm298_vm1, %v1658_v25  ;;  %v1663_v17 = vadd.f32 %v1647_v16, %v1622_v11  ;;  %v1614_v52 = vadd.f32 %v2562_v51, %v1613_v13 }
 0x5d2   : > { %v2062_v18 = vpop.f32.mrf.mxu0 }
 0x5d3   : > { %1679 = vst.msk [vmem:[%s2571_s14 + $0x70] sm:$0xff] %vm298_vm1, %v1663_v17  ;;  %v1661_v19 = vadd.f32 %v1645_v6, %v1614_v52  ;;  %v1625_v20 = vadd.f32 %v2062_v18, %v2562_v51 }
 0x5d4   : > { %v1616_v50 = vpop.f32.mrf.mxu0 }
 0x5d5   : > { %1677 = vst.msk [vmem:[%s2571_s14 + $0x60] sm:$0xff] %vm298_vm1, %v1661_v19  ;;  %v1664_v29 = vadd.f32 %v1648_v63, %v1625_v20  ;;  %v1617_v24 = vadd.f32 %v2562_v51, %v1616_v50 }
 0x5d7   : > { %1680 = vst.msk [vmem:[%s2571_s14 + $0x78] sm:$0xff] %vm298_vm1, %v1664_v29  ;;  %v1662_v28 = vadd.f32 %v1646_v23, %v1617_v24 }
 0x5d9   : > { %1678 = vst.msk [vmem:[%s2571_s14 + $0x68] sm:$0xff] %vm298_vm1, %v1662_v28 }
 0x5da PF: > { %s15_s18 = sadd.s32 1, %s2086_s18  }
 0x5db   : > { %p12_p4 = scmp.ge.s32.totalorder %s15_s18, 4  }
 0x5dd   :  { %14 = sbr.rel (!%p12_p4) target bundleno = 1 (0x1), region = 79 }

</bundles_post_ra>
